<compile_context>
chip_gen: v6e
topology: v6e:2x2x1
jax: 0.10.0
libtpu: 0.0.40
codegen_flags: <defaults>
</compile_context>

<pallas_src>
import math
import jax
import jax.numpy as jnp
from jax.experimental import pallas as pl
from jax.experimental.pallas import tpu as pltpu

# ---------------- problem constants (from the PyTorch module) ----------------
IN_CH, OUT_CH = 3, 3
KH = KW = 63
H = W = 64
OH = H - KH + 1               # 2
OW = W - KW + 1               # 2

N_PLANES = OUT_CH * OH * OW   # 12 planes: (out_ch, oh, ow)
PACK_ROWS = IN_CH * H // 2    # 96  (two h-rows packed per 128-lane row)
PACK_LANES = 2 * W            # 128 (fully lane-dense)
ROWS_PAD = 16                 # output rows padded to a multiple of 8


def _fused_kernel(x1_ref, x2_ref, w_ref, b_ref, o_ref):
    """conv(x1), conv(x2) via 12 VPU plane dot-products, then silu(c1)*silu(c2)."""
    row = jax.lax.broadcasted_iota(jnp.int32, (ROWS_PAD, PACK_LANES), 0)
    acc1 = jnp.zeros((ROWS_PAD, PACK_LANES), jnp.float32)
    acc2 = jnp.zeros((ROWS_PAD, PACK_LANES), jnp.float32)
    for idx in range(N_PLANES):                                   # static unroll (12)
        wp = w_ref[idx]                                           # (96, 128)
        r1 = jnp.sum(x1_ref[...] * wp, axis=0, keepdims=True)     # (1, 128) partial
        r2 = jnp.sum(x2_ref[...] * wp, axis=0, keepdims=True)
        sel = row == idx                                          # place into row idx
        acc1 = acc1 + jnp.where(sel, r1, 0.0)
        acc2 = acc2 + jnp.where(sel, r2, 0.0)
    b = b_ref[...]                                                # (16, 1)
    c1 = jnp.sum(acc1, axis=1, keepdims=True) + b                 # conv(x1) values
    c2 = jnp.sum(acc2, axis=1, keepdims=True) + b                 # conv(x2) values
    v3 = c1 * jax.nn.sigmoid(c1)                                  # v1 * sigmoid(v1)
    v6 = c2 * jax.nn.sigmoid(c2)                                  # v4 * sigmoid(v4)
    o_ref[...] = jnp.broadcast_to(v3 * v6, (ROWS_PAD, PACK_LANES))


def init_params(weight, bias):
    """One-time (hoisted) weight/bias preparation.

    planes[n, oh, ow, c, h, w] = weight[n, c, h-oh, w-ow] (0 outside the window), so
    conv(x)[n, oh, ow] == sum(x * planes[n, oh, ow]).  Packed lane-dense (12, 96, 128).
    """
    planes = jnp.zeros((OUT_CH, OH, OW, IN_CH, H, W), jnp.float32)
    for oh in range(OH):
        for ow in range(OW):
            planes = planes.at[:, oh, ow, :, oh:oh + KH, ow:ow + KW].set(weight)
    w_planes = planes.reshape(N_PLANES, PACK_ROWS, PACK_LANES)
    b_col = (jnp.zeros((ROWS_PAD, 1), jnp.float32)
             .at[:N_PLANES, 0].set(jnp.repeat(bias, OH * OW)))
    return jax.device_put(w_planes), jax.device_put(b_col)


@jax.jit
def model_forward(x1, x2, w_planes, b_col):
    """Equivalent of Model.forward.  x1, x2: (1,3,64,64) f32 -> (1,3,2,2)."""
    x1p = x1.reshape(PACK_ROWS, PACK_LANES)        # pure packing copy, 48 KB
    x2p = x2.reshape(PACK_ROWS, PACK_LANES)
    out = pl.pallas_call(
        _fused_kernel,
        out_shape=jax.ShapeDtypeStruct((ROWS_PAD, PACK_LANES), jnp.float32),
        in_specs=[
            pl.BlockSpec(memory_space=pltpu.VMEM),
            pl.BlockSpec(memory_space=pltpu.VMEM),
            pl.BlockSpec(memory_space=pltpu.VMEM),
            pl.BlockSpec(memory_space=pltpu.VMEM),
        ],
        out_specs=pl.BlockSpec(memory_space=pltpu.VMEM),
    )(x1p, x2p, w_planes, b_col)
    return out[:N_PLANES, 0].reshape(1, OUT_CH, OH, OW)


def reference_forward(x1, x2, weight, bias):
    """Pure-JAX reference (lax conv) for correctness check."""
    def conv(x):
        return jax.lax.conv_general_dilated(
            x, weight, window_strides=(1, 1), padding="VALID",
            dimension_numbers=("NCHW", "OIHW", "NCHW"),
        ) + bias.reshape(1, OUT_CH, 1, 1)
    v1 = conv(x1)
    v4 = conv(x2)
    return (v1 * jax.nn.sigmoid(v1)) * (v4 * jax.nn.sigmoid(v4))


if __name__ == "__main__":
    key = jax.random.PRNGKey(0)
    k1, k2, kw, kb = jax.random.split(key, 4)

    x1 = jax.random.normal(k1, (1, IN_CH, H, W), jnp.float32)
    x2 = jax.random.normal(k2, (1, IN_CH, H, W), jnp.float32)

    # deterministic Conv2d-style init: U(-bound, bound), bound = 1/sqrt(fan_in)
    fan_in = IN_CH * KH * KW
    bound = 1.0 / math.sqrt(fan_in)
    weight = jax.random.uniform(kw, (OUT_CH, IN_CH, KH, KW), jnp.float32,
                                -bound, bound)
    bias = jax.random.uniform(kb, (OUT_CH,), jnp.float32, -bound, bound)

    # one-time hoisted parameter preparation (outside the per-call path)
    w_planes, b_col = init_params(weight, bias)

    out = model_forward(x1, x2, w_planes, b_col)
    jax.block_until_ready(out)

    ref = reference_forward(x1, x2, weight, bias)
    assert out.shape == (1, OUT_CH, OH, OW)
    assert jnp.allclose(out, ref, atol=1e-4, rtol=1e-4), (out, ref)

    print("KERNEL_OK")
</pallas_src>

<mosaic_0001>
module attributes {stable_mosaic.version = 11 : i64} {
  func.func @_fused_kernel(%arg0: memref<96x128xf32, #tpu.memory_space<vmem>>, %arg1: memref<96x128xf32, #tpu.memory_space<vmem>>, %arg2: memref<12x96x128xf32, #tpu.memory_space<vmem>>, %arg3: memref<16x1xf32, #tpu.memory_space<vmem>>, %arg4: memref<16x128xf32, #tpu.memory_space<vmem>>) attributes {dimension_semantics = [], scalar_prefetch = 0 : i64, scratch_operands = 0 : i64, tpu.core_type = #tpu.core_type<tc>} {
    %0 = tpu.iota {dimensions = array<i32: 0>} : vector<16x128xi32>
    %cst = arith.constant 0.000000e+00 : f32
    %1 = vector.broadcast %cst : f32 to vector<16x128xf32>
    %cst_0 = arith.constant 0.000000e+00 : f32
    %2 = vector.broadcast %cst_0 : f32 to vector<16x128xf32>
    %c0 = arith.constant 0 : index
    %c0_1 = arith.constant 0 : index
    %c0_2 = arith.constant 0 : index
    %3 = vector.load %arg2[%c0, %c0_1, %c0_2] : memref<12x96x128xf32, #tpu.memory_space<vmem>>, vector<1x96x128xf32>
    %4 = vector.shape_cast %3 : vector<1x96x128xf32> to vector<96x128xf32>
    %c0_3 = arith.constant 0 : index
    %c0_4 = arith.constant 0 : index
    %5 = vector.load %arg0[%c0_3, %c0_4] : memref<96x128xf32, #tpu.memory_space<vmem>>, vector<96x128xf32>
    %6 = arith.mulf %5, %4 : vector<96x128xf32>
    %cst_5 = arith.constant dense<0.000000e+00> : vector<128xf32>
    %7 = vector.multi_reduction <add>, %6, %cst_5 [0] : vector<96x128xf32> to vector<128xf32>
    %8 = vector.shape_cast %7 : vector<128xf32> to vector<1x128xf32>
    %c0_6 = arith.constant 0 : index
    %c0_7 = arith.constant 0 : index
    %9 = vector.load %arg1[%c0_6, %c0_7] : memref<96x128xf32, #tpu.memory_space<vmem>>, vector<96x128xf32>
    %10 = arith.mulf %9, %4 : vector<96x128xf32>
    %cst_8 = arith.constant dense<0.000000e+00> : vector<128xf32>
    %11 = vector.multi_reduction <add>, %10, %cst_8 [0] : vector<96x128xf32> to vector<128xf32>
    %12 = vector.shape_cast %11 : vector<128xf32> to vector<1x128xf32>
    %c0_i32 = arith.constant 0 : i32
    %13 = vector.broadcast %c0_i32 : i32 to vector<16x128xi32>
    %14 = arith.cmpi eq, %0, %13 : vector<16x128xi32>
    %cst_9 = arith.constant 0.000000e+00 : f32
    %15 = vector.shape_cast %8 : vector<1x128xf32> to vector<1x128xf32>
    %16 = vector.broadcast %15 : vector<1x128xf32> to vector<16x128xf32>
    %17 = vector.broadcast %cst_9 : f32 to vector<16x128xf32>
    %18 = arith.select %14, %16, %17 : vector<16x128xi1>, vector<16x128xf32>
    %19 = arith.addf %1, %18 : vector<16x128xf32>
    %cst_10 = arith.constant 0.000000e+00 : f32
    %20 = vector.shape_cast %12 : vector<1x128xf32> to vector<1x128xf32>
    %21 = vector.broadcast %20 : vector<1x128xf32> to vector<16x128xf32>
    %22 = vector.broadcast %cst_10 : f32 to vector<16x128xf32>
    %23 = arith.select %14, %21, %22 : vector<16x128xi1>, vector<16x128xf32>
    %24 = arith.addf %2, %23 : vector<16x128xf32>
    %c1 = arith.constant 1 : index
    %c0_11 = arith.constant 0 : index
    %c0_12 = arith.constant 0 : index
    %25 = vector.load %arg2[%c1, %c0_11, %c0_12] : memref<12x96x128xf32, #tpu.memory_space<vmem>>, vector<1x96x128xf32>
    %26 = vector.shape_cast %25 : vector<1x96x128xf32> to vector<96x128xf32>
    %c0_13 = arith.constant 0 : index
    %c0_14 = arith.constant 0 : index
    %27 = vector.load %arg0[%c0_13, %c0_14] : memref<96x128xf32, #tpu.memory_space<vmem>>, vector<96x128xf32>
    %28 = arith.mulf %27, %26 : vector<96x128xf32>
    %cst_15 = arith.constant dense<0.000000e+00> : vector<128xf32>
    %29 = vector.multi_reduction <add>, %28, %cst_15 [0] : vector<96x128xf32> to vector<128xf32>
    %30 = vector.shape_cast %29 : vector<128xf32> to vector<1x128xf32>
    %c0_16 = arith.constant 0 : index
    %c0_17 = arith.constant 0 : index
    %31 = vector.load %arg1[%c0_16, %c0_17] : memref<96x128xf32, #tpu.memory_space<vmem>>, vector<96x128xf32>
    %32 = arith.mulf %31, %26 : vector<96x128xf32>
    %cst_18 = arith.constant dense<0.000000e+00> : vector<128xf32>
    %33 = vector.multi_reduction <add>, %32, %cst_18 [0] : vector<96x128xf32> to vector<128xf32>
    %34 = vector.shape_cast %33 : vector<128xf32> to vector<1x128xf32>
    %c1_i32 = arith.constant 1 : i32
    %35 = vector.broadcast %c1_i32 : i32 to vector<16x128xi32>
    %36 = arith.cmpi eq, %0, %35 : vector<16x128xi32>
    %cst_19 = arith.constant 0.000000e+00 : f32
    %37 = vector.shape_cast %30 : vector<1x128xf32> to vector<1x128xf32>
    %38 = vector.broadcast %37 : vector<1x128xf32> to vector<16x128xf32>
    %39 = vector.broadcast %cst_19 : f32 to vector<16x128xf32>
    %40 = arith.select %36, %38, %39 : vector<16x128xi1>, vector<16x128xf32>
    %41 = arith.addf %19, %40 : vector<16x128xf32>
    %cst_20 = arith.constant 0.000000e+00 : f32
    %42 = vector.shape_cast %34 : vector<1x128xf32> to vector<1x128xf32>
    %43 = vector.broadcast %42 : vector<1x128xf32> to vector<16x128xf32>
    %44 = vector.broadcast %cst_20 : f32 to vector<16x128xf32>
    %45 = arith.select %36, %43, %44 : vector<16x128xi1>, vector<16x128xf32>
    %46 = arith.addf %24, %45 : vector<16x128xf32>
    %c2 = arith.constant 2 : index
    %c0_21 = arith.constant 0 : index
    %c0_22 = arith.constant 0 : index
    %47 = vector.load %arg2[%c2, %c0_21, %c0_22] : memref<12x96x128xf32, #tpu.memory_space<vmem>>, vector<1x96x128xf32>
    %48 = vector.shape_cast %47 : vector<1x96x128xf32> to vector<96x128xf32>
    %c0_23 = arith.constant 0 : index
    %c0_24 = arith.constant 0 : index
    %49 = vector.load %arg0[%c0_23, %c0_24] : memref<96x128xf32, #tpu.memory_space<vmem>>, vector<96x128xf32>
    %50 = arith.mulf %49, %48 : vector<96x128xf32>
    %cst_25 = arith.constant dense<0.000000e+00> : vector<128xf32>
    %51 = vector.multi_reduction <add>, %50, %cst_25 [0] : vector<96x128xf32> to vector<128xf32>
    %52 = vector.shape_cast %51 : vector<128xf32> to vector<1x128xf32>
    %c0_26 = arith.constant 0 : index
    %c0_27 = arith.constant 0 : index
    %53 = vector.load %arg1[%c0_26, %c0_27] : memref<96x128xf32, #tpu.memory_space<vmem>>, vector<96x128xf32>
    %54 = arith.mulf %53, %48 : vector<96x128xf32>
    %cst_28 = arith.constant dense<0.000000e+00> : vector<128xf32>
    %55 = vector.multi_reduction <add>, %54, %cst_28 [0] : vector<96x128xf32> to vector<128xf32>
    %56 = vector.shape_cast %55 : vector<128xf32> to vector<1x128xf32>
    %c2_i32 = arith.constant 2 : i32
    %57 = vector.broadcast %c2_i32 : i32 to vector<16x128xi32>
    %58 = arith.cmpi eq, %0, %57 : vector<16x128xi32>
    %cst_29 = arith.constant 0.000000e+00 : f32
    %59 = vector.shape_cast %52 : vector<1x128xf32> to vector<1x128xf32>
    %60 = vector.broadcast %59 : vector<1x128xf32> to vector<16x128xf32>
    %61 = vector.broadcast %cst_29 : f32 to vector<16x128xf32>
    %62 = arith.select %58, %60, %61 : vector<16x128xi1>, vector<16x128xf32>
    %63 = arith.addf %41, %62 : vector<16x128xf32>
    %cst_30 = arith.constant 0.000000e+00 : f32
    %64 = vector.shape_cast %56 : vector<1x128xf32> to vector<1x128xf32>
    %65 = vector.broadcast %64 : vector<1x128xf32> to vector<16x128xf32>
    %66 = vector.broadcast %cst_30 : f32 to vector<16x128xf32>
    %67 = arith.select %58, %65, %66 : vector<16x128xi1>, vector<16x128xf32>
    %68 = arith.addf %46, %67 : vector<16x128xf32>
    %c3 = arith.constant 3 : index
    %c0_31 = arith.constant 0 : index
    %c0_32 = arith.constant 0 : index
    %69 = vector.load %arg2[%c3, %c0_31, %c0_32] : memref<12x96x128xf32, #tpu.memory_space<vmem>>, vector<1x96x128xf32>
    %70 = vector.shape_cast %69 : vector<1x96x128xf32> to vector<96x128xf32>
    %c0_33 = arith.constant 0 : index
    %c0_34 = arith.constant 0 : index
    %71 = vector.load %arg0[%c0_33, %c0_34] : memref<96x128xf32, #tpu.memory_space<vmem>>, vector<96x128xf32>
    %72 = arith.mulf %71, %70 : vector<96x128xf32>
    %cst_35 = arith.constant dense<0.000000e+00> : vector<128xf32>
    %73 = vector.multi_reduction <add>, %72, %cst_35 [0] : vector<96x128xf32> to vector<128xf32>
    %74 = vector.shape_cast %73 : vector<128xf32> to vector<1x128xf32>
    %c0_36 = arith.constant 0 : index
    %c0_37 = arith.constant 0 : index
    %75 = vector.load %arg1[%c0_36, %c0_37] : memref<96x128xf32, #tpu.memory_space<vmem>>, vector<96x128xf32>
    %76 = arith.mulf %75, %70 : vector<96x128xf32>
    %cst_38 = arith.constant dense<0.000000e+00> : vector<128xf32>
    %77 = vector.multi_reduction <add>, %76, %cst_38 [0] : vector<96x128xf32> to vector<128xf32>
    %78 = vector.shape_cast %77 : vector<128xf32> to vector<1x128xf32>
    %c3_i32 = arith.constant 3 : i32
    %79 = vector.broadcast %c3_i32 : i32 to vector<16x128xi32>
    %80 = arith.cmpi eq, %0, %79 : vector<16x128xi32>
    %cst_39 = arith.constant 0.000000e+00 : f32
    %81 = vector.shape_cast %74 : vector<1x128xf32> to vector<1x128xf32>
    %82 = vector.broadcast %81 : vector<1x128xf32> to vector<16x128xf32>
    %83 = vector.broadcast %cst_39 : f32 to vector<16x128xf32>
    %84 = arith.select %80, %82, %83 : vector<16x128xi1>, vector<16x128xf32>
    %85 = arith.addf %63, %84 : vector<16x128xf32>
    %cst_40 = arith.constant 0.000000e+00 : f32
    %86 = vector.shape_cast %78 : vector<1x128xf32> to vector<1x128xf32>
    %87 = vector.broadcast %86 : vector<1x128xf32> to vector<16x128xf32>
    %88 = vector.broadcast %cst_40 : f32 to vector<16x128xf32>
    %89 = arith.select %80, %87, %88 : vector<16x128xi1>, vector<16x128xf32>
    %90 = arith.addf %68, %89 : vector<16x128xf32>
    %c4 = arith.constant 4 : index
    %c0_41 = arith.constant 0 : index
    %c0_42 = arith.constant 0 : index
    %91 = vector.load %arg2[%c4, %c0_41, %c0_42] : memref<12x96x128xf32, #tpu.memory_space<vmem>>, vector<1x96x128xf32>
    %92 = vector.shape_cast %91 : vector<1x96x128xf32> to vector<96x128xf32>
    %c0_43 = arith.constant 0 : index
    %c0_44 = arith.constant 0 : index
    %93 = vector.load %arg0[%c0_43, %c0_44] : memref<96x128xf32, #tpu.memory_space<vmem>>, vector<96x128xf32>
    %94 = arith.mulf %93, %92 : vector<96x128xf32>
    %cst_45 = arith.constant dense<0.000000e+00> : vector<128xf32>
    %95 = vector.multi_reduction <add>, %94, %cst_45 [0] : vector<96x128xf32> to vector<128xf32>
    %96 = vector.shape_cast %95 : vector<128xf32> to vector<1x128xf32>
    %c0_46 = arith.constant 0 : index
    %c0_47 = arith.constant 0 : index
    %97 = vector.load %arg1[%c0_46, %c0_47] : memref<96x128xf32, #tpu.memory_space<vmem>>, vector<96x128xf32>
    %98 = arith.mulf %97, %92 : vector<96x128xf32>
    %cst_48 = arith.constant dense<0.000000e+00> : vector<128xf32>
    %99 = vector.multi_reduction <add>, %98, %cst_48 [0] : vector<96x128xf32> to vector<128xf32>
    %100 = vector.shape_cast %99 : vector<128xf32> to vector<1x128xf32>
    %c4_i32 = arith.constant 4 : i32
    %101 = vector.broadcast %c4_i32 : i32 to vector<16x128xi32>
    %102 = arith.cmpi eq, %0, %101 : vector<16x128xi32>
    %cst_49 = arith.constant 0.000000e+00 : f32
    %103 = vector.shape_cast %96 : vector<1x128xf32> to vector<1x128xf32>
    %104 = vector.broadcast %103 : vector<1x128xf32> to vector<16x128xf32>
    %105 = vector.broadcast %cst_49 : f32 to vector<16x128xf32>
    %106 = arith.select %102, %104, %105 : vector<16x128xi1>, vector<16x128xf32>
    %107 = arith.addf %85, %106 : vector<16x128xf32>
    %cst_50 = arith.constant 0.000000e+00 : f32
    %108 = vector.shape_cast %100 : vector<1x128xf32> to vector<1x128xf32>
    %109 = vector.broadcast %108 : vector<1x128xf32> to vector<16x128xf32>
    %110 = vector.broadcast %cst_50 : f32 to vector<16x128xf32>
    %111 = arith.select %102, %109, %110 : vector<16x128xi1>, vector<16x128xf32>
    %112 = arith.addf %90, %111 : vector<16x128xf32>
    %c5 = arith.constant 5 : index
    %c0_51 = arith.constant 0 : index
    %c0_52 = arith.constant 0 : index
    %113 = vector.load %arg2[%c5, %c0_51, %c0_52] : memref<12x96x128xf32, #tpu.memory_space<vmem>>, vector<1x96x128xf32>
    %114 = vector.shape_cast %113 : vector<1x96x128xf32> to vector<96x128xf32>
    %c0_53 = arith.constant 0 : index
    %c0_54 = arith.constant 0 : index
    %115 = vector.load %arg0[%c0_53, %c0_54] : memref<96x128xf32, #tpu.memory_space<vmem>>, vector<96x128xf32>
    %116 = arith.mulf %115, %114 : vector<96x128xf32>
    %cst_55 = arith.constant dense<0.000000e+00> : vector<128xf32>
    %117 = vector.multi_reduction <add>, %116, %cst_55 [0] : vector<96x128xf32> to vector<128xf32>
    %118 = vector.shape_cast %117 : vector<128xf32> to vector<1x128xf32>
    %c0_56 = arith.constant 0 : index
    %c0_57 = arith.constant 0 : index
    %119 = vector.load %arg1[%c0_56, %c0_57] : memref<96x128xf32, #tpu.memory_space<vmem>>, vector<96x128xf32>
    %120 = arith.mulf %119, %114 : vector<96x128xf32>
    %cst_58 = arith.constant dense<0.000000e+00> : vector<128xf32>
    %121 = vector.multi_reduction <add>, %120, %cst_58 [0] : vector<96x128xf32> to vector<128xf32>
    %122 = vector.shape_cast %121 : vector<128xf32> to vector<1x128xf32>
    %c5_i32 = arith.constant 5 : i32
    %123 = vector.broadcast %c5_i32 : i32 to vector<16x128xi32>
    %124 = arith.cmpi eq, %0, %123 : vector<16x128xi32>
    %cst_59 = arith.constant 0.000000e+00 : f32
    %125 = vector.shape_cast %118 : vector<1x128xf32> to vector<1x128xf32>
    %126 = vector.broadcast %125 : vector<1x128xf32> to vector<16x128xf32>
    %127 = vector.broadcast %cst_59 : f32 to vector<16x128xf32>
    %128 = arith.select %124, %126, %127 : vector<16x128xi1>, vector<16x128xf32>
    %129 = arith.addf %107, %128 : vector<16x128xf32>
    %cst_60 = arith.constant 0.000000e+00 : f32
    %130 = vector.shape_cast %122 : vector<1x128xf32> to vector<1x128xf32>
    %131 = vector.broadcast %130 : vector<1x128xf32> to vector<16x128xf32>
    %132 = vector.broadcast %cst_60 : f32 to vector<16x128xf32>
    %133 = arith.select %124, %131, %132 : vector<16x128xi1>, vector<16x128xf32>
    %134 = arith.addf %112, %133 : vector<16x128xf32>
    %c6 = arith.constant 6 : index
    %c0_61 = arith.constant 0 : index
    %c0_62 = arith.constant 0 : index
    %135 = vector.load %arg2[%c6, %c0_61, %c0_62] : memref<12x96x128xf32, #tpu.memory_space<vmem>>, vector<1x96x128xf32>
    %136 = vector.shape_cast %135 : vector<1x96x128xf32> to vector<96x128xf32>
    %c0_63 = arith.constant 0 : index
    %c0_64 = arith.constant 0 : index
    %137 = vector.load %arg0[%c0_63, %c0_64] : memref<96x128xf32, #tpu.memory_space<vmem>>, vector<96x128xf32>
    %138 = arith.mulf %137, %136 : vector<96x128xf32>
    %cst_65 = arith.constant dense<0.000000e+00> : vector<128xf32>
    %139 = vector.multi_reduction <add>, %138, %cst_65 [0] : vector<96x128xf32> to vector<128xf32>
    %140 = vector.shape_cast %139 : vector<128xf32> to vector<1x128xf32>
    %c0_66 = arith.constant 0 : index
    %c0_67 = arith.constant 0 : index
    %141 = vector.load %arg1[%c0_66, %c0_67] : memref<96x128xf32, #tpu.memory_space<vmem>>, vector<96x128xf32>
    %142 = arith.mulf %141, %136 : vector<96x128xf32>
    %cst_68 = arith.constant dense<0.000000e+00> : vector<128xf32>
    %143 = vector.multi_reduction <add>, %142, %cst_68 [0] : vector<96x128xf32> to vector<128xf32>
    %144 = vector.shape_cast %143 : vector<128xf32> to vector<1x128xf32>
    %c6_i32 = arith.constant 6 : i32
    %145 = vector.broadcast %c6_i32 : i32 to vector<16x128xi32>
    %146 = arith.cmpi eq, %0, %145 : vector<16x128xi32>
    %cst_69 = arith.constant 0.000000e+00 : f32
    %147 = vector.shape_cast %140 : vector<1x128xf32> to vector<1x128xf32>
    %148 = vector.broadcast %147 : vector<1x128xf32> to vector<16x128xf32>
    %149 = vector.broadcast %cst_69 : f32 to vector<16x128xf32>
    %150 = arith.select %146, %148, %149 : vector<16x128xi1>, vector<16x128xf32>
    %151 = arith.addf %129, %150 : vector<16x128xf32>
    %cst_70 = arith.constant 0.000000e+00 : f32
    %152 = vector.shape_cast %144 : vector<1x128xf32> to vector<1x128xf32>
    %153 = vector.broadcast %152 : vector<1x128xf32> to vector<16x128xf32>
    %154 = vector.broadcast %cst_70 : f32 to vector<16x128xf32>
    %155 = arith.select %146, %153, %154 : vector<16x128xi1>, vector<16x128xf32>
    %156 = arith.addf %134, %155 : vector<16x128xf32>
    %c7 = arith.constant 7 : index
    %c0_71 = arith.constant 0 : index
    %c0_72 = arith.constant 0 : index
    %157 = vector.load %arg2[%c7, %c0_71, %c0_72] : memref<12x96x128xf32, #tpu.memory_space<vmem>>, vector<1x96x128xf32>
    %158 = vector.shape_cast %157 : vector<1x96x128xf32> to vector<96x128xf32>
    %c0_73 = arith.constant 0 : index
    %c0_74 = arith.constant 0 : index
    %159 = vector.load %arg0[%c0_73, %c0_74] : memref<96x128xf32, #tpu.memory_space<vmem>>, vector<96x128xf32>
    %160 = arith.mulf %159, %158 : vector<96x128xf32>
    %cst_75 = arith.constant dense<0.000000e+00> : vector<128xf32>
    %161 = vector.multi_reduction <add>, %160, %cst_75 [0] : vector<96x128xf32> to vector<128xf32>
    %162 = vector.shape_cast %161 : vector<128xf32> to vector<1x128xf32>
    %c0_76 = arith.constant 0 : index
    %c0_77 = arith.constant 0 : index
    %163 = vector.load %arg1[%c0_76, %c0_77] : memref<96x128xf32, #tpu.memory_space<vmem>>, vector<96x128xf32>
    %164 = arith.mulf %163, %158 : vector<96x128xf32>
    %cst_78 = arith.constant dense<0.000000e+00> : vector<128xf32>
    %165 = vector.multi_reduction <add>, %164, %cst_78 [0] : vector<96x128xf32> to vector<128xf32>
    %166 = vector.shape_cast %165 : vector<128xf32> to vector<1x128xf32>
    %c7_i32 = arith.constant 7 : i32
    %167 = vector.broadcast %c7_i32 : i32 to vector<16x128xi32>
    %168 = arith.cmpi eq, %0, %167 : vector<16x128xi32>
    %cst_79 = arith.constant 0.000000e+00 : f32
    %169 = vector.shape_cast %162 : vector<1x128xf32> to vector<1x128xf32>
    %170 = vector.broadcast %169 : vector<1x128xf32> to vector<16x128xf32>
    %171 = vector.broadcast %cst_79 : f32 to vector<16x128xf32>
    %172 = arith.select %168, %170, %171 : vector<16x128xi1>, vector<16x128xf32>
    %173 = arith.addf %151, %172 : vector<16x128xf32>
    %cst_80 = arith.constant 0.000000e+00 : f32
    %174 = vector.shape_cast %166 : vector<1x128xf32> to vector<1x128xf32>
    %175 = vector.broadcast %174 : vector<1x128xf32> to vector<16x128xf32>
    %176 = vector.broadcast %cst_80 : f32 to vector<16x128xf32>
    %177 = arith.select %168, %175, %176 : vector<16x128xi1>, vector<16x128xf32>
    %178 = arith.addf %156, %177 : vector<16x128xf32>
    %c8 = arith.constant 8 : index
    %c0_81 = arith.constant 0 : index
    %c0_82 = arith.constant 0 : index
    %179 = vector.load %arg2[%c8, %c0_81, %c0_82] : memref<12x96x128xf32, #tpu.memory_space<vmem>>, vector<1x96x128xf32>
    %180 = vector.shape_cast %179 : vector<1x96x128xf32> to vector<96x128xf32>
    %c0_83 = arith.constant 0 : index
    %c0_84 = arith.constant 0 : index
    %181 = vector.load %arg0[%c0_83, %c0_84] : memref<96x128xf32, #tpu.memory_space<vmem>>, vector<96x128xf32>
    %182 = arith.mulf %181, %180 : vector<96x128xf32>
    %cst_85 = arith.constant dense<0.000000e+00> : vector<128xf32>
    %183 = vector.multi_reduction <add>, %182, %cst_85 [0] : vector<96x128xf32> to vector<128xf32>
    %184 = vector.shape_cast %183 : vector<128xf32> to vector<1x128xf32>
    %c0_86 = arith.constant 0 : index
    %c0_87 = arith.constant 0 : index
    %185 = vector.load %arg1[%c0_86, %c0_87] : memref<96x128xf32, #tpu.memory_space<vmem>>, vector<96x128xf32>
    %186 = arith.mulf %185, %180 : vector<96x128xf32>
    %cst_88 = arith.constant dense<0.000000e+00> : vector<128xf32>
    %187 = vector.multi_reduction <add>, %186, %cst_88 [0] : vector<96x128xf32> to vector<128xf32>
    %188 = vector.shape_cast %187 : vector<128xf32> to vector<1x128xf32>
    %c8_i32 = arith.constant 8 : i32
    %189 = vector.broadcast %c8_i32 : i32 to vector<16x128xi32>
    %190 = arith.cmpi eq, %0, %189 : vector<16x128xi32>
    %cst_89 = arith.constant 0.000000e+00 : f32
    %191 = vector.shape_cast %184 : vector<1x128xf32> to vector<1x128xf32>
    %192 = vector.broadcast %191 : vector<1x128xf32> to vector<16x128xf32>
    %193 = vector.broadcast %cst_89 : f32 to vector<16x128xf32>
    %194 = arith.select %190, %192, %193 : vector<16x128xi1>, vector<16x128xf32>
    %195 = arith.addf %173, %194 : vector<16x128xf32>
    %cst_90 = arith.constant 0.000000e+00 : f32
    %196 = vector.shape_cast %188 : vector<1x128xf32> to vector<1x128xf32>
    %197 = vector.broadcast %196 : vector<1x128xf32> to vector<16x128xf32>
    %198 = vector.broadcast %cst_90 : f32 to vector<16x128xf32>
    %199 = arith.select %190, %197, %198 : vector<16x128xi1>, vector<16x128xf32>
    %200 = arith.addf %178, %199 : vector<16x128xf32>
    %c9 = arith.constant 9 : index
    %c0_91 = arith.constant 0 : index
    %c0_92 = arith.constant 0 : index
    %201 = vector.load %arg2[%c9, %c0_91, %c0_92] : memref<12x96x128xf32, #tpu.memory_space<vmem>>, vector<1x96x128xf32>
    %202 = vector.shape_cast %201 : vector<1x96x128xf32> to vector<96x128xf32>
    %c0_93 = arith.constant 0 : index
    %c0_94 = arith.constant 0 : index
    %203 = vector.load %arg0[%c0_93, %c0_94] : memref<96x128xf32, #tpu.memory_space<vmem>>, vector<96x128xf32>
    %204 = arith.mulf %203, %202 : vector<96x128xf32>
    %cst_95 = arith.constant dense<0.000000e+00> : vector<128xf32>
    %205 = vector.multi_reduction <add>, %204, %cst_95 [0] : vector<96x128xf32> to vector<128xf32>
    %206 = vector.shape_cast %205 : vector<128xf32> to vector<1x128xf32>
    %c0_96 = arith.constant 0 : index
    %c0_97 = arith.constant 0 : index
    %207 = vector.load %arg1[%c0_96, %c0_97] : memref<96x128xf32, #tpu.memory_space<vmem>>, vector<96x128xf32>
    %208 = arith.mulf %207, %202 : vector<96x128xf32>
    %cst_98 = arith.constant dense<0.000000e+00> : vector<128xf32>
    %209 = vector.multi_reduction <add>, %208, %cst_98 [0] : vector<96x128xf32> to vector<128xf32>
    %210 = vector.shape_cast %209 : vector<128xf32> to vector<1x128xf32>
    %c9_i32 = arith.constant 9 : i32
    %211 = vector.broadcast %c9_i32 : i32 to vector<16x128xi32>
    %212 = arith.cmpi eq, %0, %211 : vector<16x128xi32>
    %cst_99 = arith.constant 0.000000e+00 : f32
    %213 = vector.shape_cast %206 : vector<1x128xf32> to vector<1x128xf32>
    %214 = vector.broadcast %213 : vector<1x128xf32> to vector<16x128xf32>
    %215 = vector.broadcast %cst_99 : f32 to vector<16x128xf32>
    %216 = arith.select %212, %214, %215 : vector<16x128xi1>, vector<16x128xf32>
    %217 = arith.addf %195, %216 : vector<16x128xf32>
    %cst_100 = arith.constant 0.000000e+00 : f32
    %218 = vector.shape_cast %210 : vector<1x128xf32> to vector<1x128xf32>
    %219 = vector.broadcast %218 : vector<1x128xf32> to vector<16x128xf32>
    %220 = vector.broadcast %cst_100 : f32 to vector<16x128xf32>
    %221 = arith.select %212, %219, %220 : vector<16x128xi1>, vector<16x128xf32>
    %222 = arith.addf %200, %221 : vector<16x128xf32>
    %c10 = arith.constant 10 : index
    %c0_101 = arith.constant 0 : index
    %c0_102 = arith.constant 0 : index
    %223 = vector.load %arg2[%c10, %c0_101, %c0_102] : memref<12x96x128xf32, #tpu.memory_space<vmem>>, vector<1x96x128xf32>
    %224 = vector.shape_cast %223 : vector<1x96x128xf32> to vector<96x128xf32>
    %c0_103 = arith.constant 0 : index
    %c0_104 = arith.constant 0 : index
    %225 = vector.load %arg0[%c0_103, %c0_104] : memref<96x128xf32, #tpu.memory_space<vmem>>, vector<96x128xf32>
    %226 = arith.mulf %225, %224 : vector<96x128xf32>
    %cst_105 = arith.constant dense<0.000000e+00> : vector<128xf32>
    %227 = vector.multi_reduction <add>, %226, %cst_105 [0] : vector<96x128xf32> to vector<128xf32>
    %228 = vector.shape_cast %227 : vector<128xf32> to vector<1x128xf32>
    %c0_106 = arith.constant 0 : index
    %c0_107 = arith.constant 0 : index
    %229 = vector.load %arg1[%c0_106, %c0_107] : memref<96x128xf32, #tpu.memory_space<vmem>>, vector<96x128xf32>
    %230 = arith.mulf %229, %224 : vector<96x128xf32>
    %cst_108 = arith.constant dense<0.000000e+00> : vector<128xf32>
    %231 = vector.multi_reduction <add>, %230, %cst_108 [0] : vector<96x128xf32> to vector<128xf32>
    %232 = vector.shape_cast %231 : vector<128xf32> to vector<1x128xf32>
    %c10_i32 = arith.constant 10 : i32
    %233 = vector.broadcast %c10_i32 : i32 to vector<16x128xi32>
    %234 = arith.cmpi eq, %0, %233 : vector<16x128xi32>
    %cst_109 = arith.constant 0.000000e+00 : f32
    %235 = vector.shape_cast %228 : vector<1x128xf32> to vector<1x128xf32>
    %236 = vector.broadcast %235 : vector<1x128xf32> to vector<16x128xf32>
    %237 = vector.broadcast %cst_109 : f32 to vector<16x128xf32>
    %238 = arith.select %234, %236, %237 : vector<16x128xi1>, vector<16x128xf32>
    %239 = arith.addf %217, %238 : vector<16x128xf32>
    %cst_110 = arith.constant 0.000000e+00 : f32
    %240 = vector.shape_cast %232 : vector<1x128xf32> to vector<1x128xf32>
    %241 = vector.broadcast %240 : vector<1x128xf32> to vector<16x128xf32>
    %242 = vector.broadcast %cst_110 : f32 to vector<16x128xf32>
    %243 = arith.select %234, %241, %242 : vector<16x128xi1>, vector<16x128xf32>
    %244 = arith.addf %222, %243 : vector<16x128xf32>
    %c11 = arith.constant 11 : index
    %c0_111 = arith.constant 0 : index
    %c0_112 = arith.constant 0 : index
    %245 = vector.load %arg2[%c11, %c0_111, %c0_112] : memref<12x96x128xf32, #tpu.memory_space<vmem>>, vector<1x96x128xf32>
    %246 = vector.shape_cast %245 : vector<1x96x128xf32> to vector<96x128xf32>
    %c0_113 = arith.constant 0 : index
    %c0_114 = arith.constant 0 : index
    %247 = vector.load %arg0[%c0_113, %c0_114] : memref<96x128xf32, #tpu.memory_space<vmem>>, vector<96x128xf32>
    %248 = arith.mulf %247, %246 : vector<96x128xf32>
    %cst_115 = arith.constant dense<0.000000e+00> : vector<128xf32>
    %249 = vector.multi_reduction <add>, %248, %cst_115 [0] : vector<96x128xf32> to vector<128xf32>
    %250 = vector.shape_cast %249 : vector<128xf32> to vector<1x128xf32>
    %c0_116 = arith.constant 0 : index
    %c0_117 = arith.constant 0 : index
    %251 = vector.load %arg1[%c0_116, %c0_117] : memref<96x128xf32, #tpu.memory_space<vmem>>, vector<96x128xf32>
    %252 = arith.mulf %251, %246 : vector<96x128xf32>
    %cst_118 = arith.constant dense<0.000000e+00> : vector<128xf32>
    %253 = vector.multi_reduction <add>, %252, %cst_118 [0] : vector<96x128xf32> to vector<128xf32>
    %254 = vector.shape_cast %253 : vector<128xf32> to vector<1x128xf32>
    %c11_i32 = arith.constant 11 : i32
    %255 = vector.broadcast %c11_i32 : i32 to vector<16x128xi32>
    %256 = arith.cmpi eq, %0, %255 : vector<16x128xi32>
    %cst_119 = arith.constant 0.000000e+00 : f32
    %257 = vector.shape_cast %250 : vector<1x128xf32> to vector<1x128xf32>
    %258 = vector.broadcast %257 : vector<1x128xf32> to vector<16x128xf32>
    %259 = vector.broadcast %cst_119 : f32 to vector<16x128xf32>
    %260 = arith.select %256, %258, %259 : vector<16x128xi1>, vector<16x128xf32>
    %261 = arith.addf %239, %260 : vector<16x128xf32>
    %cst_120 = arith.constant 0.000000e+00 : f32
    %262 = vector.shape_cast %254 : vector<1x128xf32> to vector<1x128xf32>
    %263 = vector.broadcast %262 : vector<1x128xf32> to vector<16x128xf32>
    %264 = vector.broadcast %cst_120 : f32 to vector<16x128xf32>
    %265 = arith.select %256, %263, %264 : vector<16x128xi1>, vector<16x128xf32>
    %266 = arith.addf %244, %265 : vector<16x128xf32>
    %c0_121 = arith.constant 0 : index
    %c0_122 = arith.constant 0 : index
    %267 = vector.load %arg3[%c0_121, %c0_122] : memref<16x1xf32, #tpu.memory_space<vmem>>, vector<16x1xf32>
    %cst_123 = arith.constant dense<0.000000e+00> : vector<16xf32>
    %268 = vector.multi_reduction <add>, %261, %cst_123 [1] : vector<16x128xf32> to vector<16xf32>
    %269 = vector.shape_cast %268 : vector<16xf32> to vector<16x1xf32>
    %270 = arith.addf %269, %267 : vector<16x1xf32>
    %cst_124 = arith.constant dense<0.000000e+00> : vector<16xf32>
    %271 = vector.multi_reduction <add>, %266, %cst_124 [1] : vector<16x128xf32> to vector<16xf32>
    %272 = vector.shape_cast %271 : vector<16xf32> to vector<16x1xf32>
    %273 = arith.addf %272, %267 : vector<16x1xf32>
    %274 = arith.negf %270 : vector<16x1xf32>
    %275 = math.exp %274 : vector<16x1xf32>
    %cst_125 = arith.constant 1.000000e+00 : f32
    %276 = vector.broadcast %cst_125 : f32 to vector<16x1xf32>
    %277 = arith.addf %276, %275 : vector<16x1xf32>
    %278 = arith.divf %276, %277 : vector<16x1xf32>
    %279 = arith.mulf %270, %278 : vector<16x1xf32>
    %280 = arith.negf %273 : vector<16x1xf32>
    %281 = math.exp %280 : vector<16x1xf32>
    %cst_126 = arith.constant 1.000000e+00 : f32
    %282 = vector.broadcast %cst_126 : f32 to vector<16x1xf32>
    %283 = arith.addf %282, %281 : vector<16x1xf32>
    %284 = arith.divf %282, %283 : vector<16x1xf32>
    %285 = arith.mulf %273, %284 : vector<16x1xf32>
    %286 = arith.mulf %279, %285 : vector<16x1xf32>
    %287 = vector.shape_cast %286 : vector<16x1xf32> to vector<16x1xf32>
    %288 = vector.broadcast %287 : vector<16x1xf32> to vector<16x128xf32>
    %c0_127 = arith.constant 0 : index
    %c0_128 = arith.constant 0 : index
    %289 = vector.load %arg4[%c0_127, %c0_128] : memref<16x128xf32, #tpu.memory_space<vmem>>, vector<16x128xf32>
    tpu.vector_store %arg4[%c0_127, %c0_128], %288 {strides = array<i32>} : memref<16x128xf32, #tpu.memory_space<vmem>>, vector<16x128xf32>,
    return
  }
}

</mosaic_0001>

<bundles_post_ra>
// kernel: squeeze.1
= control target key start
LH: loop header
LB: loop body
LE: loop exit
PB: predicated region body
PF: predicated region fallthrough
CT: control target
= control target key end

     0   :  { %vm8_vm0 = vcmask 15360   ;;  %s70_s8 = smov 122   ;;  %s71_s9 = smov 124   ;;  %s102_s0 = inlined_call_operand.vmem [shape: f32[12], index: 0, kind: input, shape index: {}]   ;;  %s103_s1 = inlined_call_operand.vmem [shape: f32[1,3,2,2], index: 1, kind: output, shape index: {}]  }
   0x1   :  { %v5_v0 = vld [vmem:[%s102_s0] sm:$0x1]  ;;  %s69_s0 = smov 126   ;;  %s72_s10 = smov 120  }
   0x2   :  { %6 = vst [vmem:[#allocation1] sm:$0x1] %v5_v0  ;;  %s73_s11 = smov 118  }
   0x9   :  { %v10_v1 = vld [vmem:[#allocation1] sm:$0x1]  }
   0xa   :  { %v22_v2 = vld [vmem:[#allocation1] sm:$0x1]   ;;  %11 = vrot.lane.b32.xlu0 %v10_v1, %s69_s0 }
   0xb   :  { %23 = vrot.lane.b32.xlu1 %v22_v2, %s70_s8  ;;  %v7_v3 = vld [vmem:[#allocation1] sm:$0x1]  }
   0xc   :  { %v16_v4 = vld [vmem:[#allocation1] sm:$0x1]   ;;  %9 = vst.msk [vmem:[#allocation0] sm:$0x1] %vm8_vm0, %v7_v3  }
   0xd   :  { %v28_v5 = vld [vmem:[#allocation1] sm:$0x1]  }
   0xe   :  { %17 = vrot.lane.b32.xlu0 %v16_v4, %s71_s9  ;;  %v34_v6 = vld [vmem:[#allocation1] sm:$0x1]  }
   0xf   :  { %29 = vrot.lane.b32.xlu1 %v28_v5, %s72_s10 }
  0x12   :  { %35 = vrot.lane.b32.xlu0 %v34_v6, %s73_s11 }
  0x7c   :  { %v12_v7 = vpop.permute.xlu0 %11  }
  0x7d   :  { %v24_v8 = vpop.permute.xlu1 %23   ;;  %15 = vst.msk [vmem:[#allocation0 + $0x1] sm:$0x1] %vm8_vm0, %v12_v7  }
  0x7e   :  { %27 = vst.msk [vmem:[#allocation0 + $0x9] sm:$0x1] %vm8_vm0, %v24_v8  }
  0x80   :  { %v18_v9 = vpop.permute.xlu0 %17  }
  0x81   :  { %v30_v10 = vpop.permute.xlu1 %29   ;;  %21 = vst.msk [vmem:[#allocation0 + $0x8] sm:$0x1] %vm8_vm0, %v18_v9  }
  0x82   :  { %33 = vst.msk [vmem:[#allocation0 + $0x10] sm:$0x1] %vm8_vm0, %v30_v10  }
  0x84   :  { %v44_v11 = vld [vmem:[#allocation0] sm:$0x3]  ;;  %v36_v12 = vpop.permute.xlu0 %35  }
  0x85   :  { %47 = vst [vmem:[%s103_s1] sm:$0x3] %v44_v11  ;;  %39 = vst.msk [vmem:[#allocation0 + $0x11] sm:$0x1] %vm8_vm0, %v36_v12  }
  0x88   :  { %v49_v13 = vld [vmem:[#allocation0 + $0x8] sm:$0x3] }
  0x89   :  { %62 = vst [vmem:[%s103_s1 + $0x2] sm:$0x3] %v49_v13 }
  0x8c   :  { %v55_v14 = vld [vmem:[#allocation0 + $0x10] sm:$0x3] }
  0x8d   :  { %63 = vst [vmem:[%s103_s1 + $0x4] sm:$0x3] %v55_v14 }

// kernel: model_forward.1
= control target key start
LH: loop header
LB: loop body
LE: loop exit
PB: predicated region body
PF: predicated region fallthrough
CT: control target
= control target key end

     0   :  { %9 = vsyncpa [#allocation3], 0  ;;  %s1162_s15 = smov [#allocation2]   ;;  %s2342_s0 = inlined_call_operand.vmem [shape: f32[96,128], index: 0, kind: input, shape index: {}]   ;;  %s2343_s1 = inlined_call_operand.vmem [shape: f32[96,128], index: 1, kind: input, shape index: {}]   ;;  %s2344_s2 = inlined_call_operand.hbm [shape: f32[12,96,128], index: 2, kind: input, shape index: {}]   ;;  %s2345_s3 = inlined_call_operand.vmem [shape: f32[16,1], index: 3, kind: input, shape index: {}]   ;;  %s2346_s4 = inlined_call_operand.vmem [shape: f32[16,128], index: 4, kind: output, shape index: {}]  }
   0x1   :  { %s19_s16 = sshll.u32 %s1162_s15, 4  ;;  %s20_s16 = int_to_ptr.vmem [resolvable:$true] %s19_s16 }
   0x2   :  { %s1148_s17 = scalar_lea.vmem %s20_s16, 18432  ;;  %p1153_p1 = scmp.lt.s32.totalorder %s20_s16, %s20_s16 }
   0x3   :  { %p1149_p0 = scmp.ne.s32.totalorder %s20_s16, %s1148_s17  ;;  %p1154_p2 = scmp.lt.s32.totalorder %s1148_s17, %s1148_s17 }
   0x5   :  { %p1155_p3 = por %p1154_p2, %p1153_p1 }
   0x7   :  { %p1156_p4 = pnand %p1155_p3, %p1149_p0 }
   0x9   :  { %1159 = shalt.err (!%p1156_p4)
}
   0xa   :  { %s1163_s18 = smov 128   ;;  %s1164_s19 = smov 8  }
   0xb   :  { %25 = dma.hbm_to_vmem [thread:$0]  %s2344_s2, 18432, %s20_s16, [#allocation3], %s1163_s18, %s1163_s18, %s1164_s19  }
   0xc   :  { %1160 = dma.done.wait [#allocation3], 18432  }
   0xd   :  { %1161 = vsyncadd [#allocation3], 4294948864  ;;  %v1194_v0 = vld [vmem:[#allocation2] sm:$0xff]  ;;  %v1196_v1 = vld [vmem:[#allocation2 + $0x8] sm:$0xff]  ;;  %v31_v18 = vlaneseq }
   0xe   :  { %v1198_v2 = vld [vmem:[#allocation2 + $0x10] sm:$0xff]  ;;  %v1200_v3 = vld [vmem:[#allocation2 + $0x18] sm:$0xff]  ;;  %v1205_v4 = vld [vmem:[%s2343_s1] sm:$0xff] }
   0xf   :  { %v1210_v5 = vld [vmem:[%s2343_s1 + $0x8] sm:$0xff]  ;;  %v1215_v6 = vld [vmem:[%s2343_s1 + $0x10] sm:$0xff]  ;;  %v1220_v7 = vld [vmem:[%s2343_s1 + $0x18] sm:$0xff]  ;;  %v99_v8 = vmul.f32 %v1205_v4, %v1194_v0  ;;  %v1306_v42 = vshrl.u32 %v31_v18, 7 }
  0x10   :  { %v100_v9 = vmul.f32 %v1210_v5, %v1196_v1  ;;  %v101_v10 = vmul.f32 %v1215_v6, %v1198_v2  ;;  %v1228_v11 = vld [vmem:[#allocation2 + $0x20] sm:$0xff]  ;;  %v1235_v13 = vld [vmem:[#allocation2 + $0x28] sm:$0xff]  ;;  %v1237_v14 = vld [vmem:[#allocation2 + $0x30] sm:$0xff]  ;;  %v102_v16 = vmul.f32 %v1220_v7, %v1200_v3 }
  0x11   :  { %v1233_v12 = vld [vmem:[%s2343_s1 + $0x20] sm:$0xff]  ;;  %v1242_v15 = vld [vmem:[%s2343_s1 + $0x28] sm:$0xff]  ;;  %v1246_v19 = vld [vmem:[#allocation2 + $0x38] sm:$0xff]  ;;  %vm128_vm0 = vcmp.eq.s32.totalorder %v1306_v42, 0  ;;  %vm209_vm1 = vcmp.eq.s32.totalorder %v1306_v42, 1  ;;  %vm290_vm2 = vcmp.eq.s32.totalorder %v1306_v42, 2 }
  0x12   :  { %v111_v17 = vadd.f32 %v100_v9, %v99_v8  ;;  %v1248_v20 = vld [vmem:[#allocation2 + $0x60] sm:$0xff]  ;;  %v1250_v21 = vld [vmem:[#allocation2 + $0x68] sm:$0xff]  ;;  %v1252_v22 = vld [vmem:[#allocation2 + $0x70] sm:$0xff]  ;;  %v103_v26 = vmul.f32 %v1233_v12, %v1228_v11  ;;  %v104_v39 = vmul.f32 %v1242_v15, %v1235_v13  ;;  %vm371_vm3 = vcmp.eq.s32.totalorder %v1306_v42, 3 }
  0x13   :  { %v1254_v23 = vld [vmem:[#allocation2 + $0x40] sm:$0xff]  ;;  %v1256_v24 = vld [vmem:[#allocation2 + $0x48] sm:$0xff]  ;;  %v1261_v25 = vld [vmem:[%s2343_s1 + $0x30] sm:$0xff]  ;;  %v180_v29 = vmul.f32 %v1248_v20, %v1205_v4  ;;  %v181_v30 = vmul.f32 %v1250_v21, %v1210_v5  ;;  %v182_v36 = vmul.f32 %v1252_v22, %v1215_v6  ;;  %vm452_vm4 = vcmp.eq.s32.totalorder %v1306_v42, 4 }
  0x14   :  { %v112_v27 = vadd.f32 %v111_v17, %v101_v10  ;;  %v1265_v28 = vld [vmem:[#allocation2 + $0x78] sm:$0xff]  ;;  %v1271_v31 = vld [vmem:[#allocation2 + $0x50] sm:$0xff]  ;;  %v1283_v34 = vld [vmem:[%s2343_s1 + $0x40] sm:$0xff]  ;;  %v105_v43 = vmul.f32 %v1261_v25, %v1237_v14  ;;  %vm533_vm5 = vcmp.eq.s32.totalorder %v1306_v42, 5  ;;  %vm614_vm6 = vcmp.eq.s32.totalorder %v1306_v42, 6 }
  0x15   :  { %2444 = vst [vmem:[#allocation5_spill] sm:$0xff] %v1265_v28  ;;  %2445 = vst [vmem:[#allocation6_spill] sm:$0xff] %v1271_v31  ;;  %v1273_v32 = vld [vmem:[#allocation2 + $0x58] sm:$0xff]  ;;  %v1288_v35 = vld [vmem:[%s2343_s1 + $0x48] sm:$0xff]  ;;  %v183_v44 = vmul.f32 %v1265_v28, %v1220_v7  ;;  %v192_v45 = vadd.f32 %v181_v30, %v180_v29  ;;  %v107_v56 = vmul.f32 %v1283_v34, %v1254_v23  ;;  %vm695_vm7 = vcmp.eq.s32.totalorder %v1306_v42, 7 }
  0x16   :  { %2446 = vst [vmem:[#allocation7_spill] sm:$0xff] %v1273_v32  ;;  %v1278_v33 = vld [vmem:[%s2343_s1 + $0x38] sm:$0xff]  ;;  %v1295_v37 = vld [vmem:[%s2343_s1 + $0x50] sm:$0xff]  ;;  %v113_v40 = vadd.f32 %v112_v27, %v102_v16  ;;  %v1304_v41 = vld [vmem:[#allocation2 + $0x80] sm:$0xff]  ;;  %v108_v57 = vmul.f32 %v1288_v35, %v1256_v24 }
  0x17   :  { %v1300_v38 = vld [vmem:[%s2343_s1 + $0x58] sm:$0xff]  ;;  %2447 = vst [vmem:[#allocation8_spill] sm:$0xff] %v1304_v41  ;;  %v1312_v46 = vld [vmem:[#allocation2 + $0xc0] sm:$0xff]  ;;  %v1314_v47 = vld [vmem:[#allocation2 + $0xc8] sm:$0xff]  ;;  %v106_v49 = vmul.f32 %v1278_v33, %v1246_v19  ;;  %v184_v59 = vmul.f32 %v1304_v41, %v1233_v12  ;;  %v193_v60 = vadd.f32 %v192_v45, %v182_v36  ;;  %v109_v62 = vmul.f32 %v1295_v37, %v1271_v31 }
  0x18   :  { %2448 = vst [vmem:[#allocation9_spill] sm:$0xff] %v1312_v46  ;;  %2449 = vst [vmem:[#allocation10_spill] sm:$0xff] %v1314_v47  ;;  %v1316_v48 = vld [vmem:[#allocation2 + $0xd0] sm:$0xff]  ;;  %v114_v50 = vadd.f32 %v113_v40, %v103_v26  ;;  %v1320_v51 = vld [vmem:[#allocation2 + $0x88] sm:$0xff]  ;;  %v261_v54 = vmul.f32 %v1312_v46, %v1205_v4  ;;  %v262_v55 = vmul.f32 %v1314_v47, %v1210_v5 }
  0x19   :  { %2450 = vst [vmem:[#allocation11_spill] sm:$0xff] %v1316_v48  ;;  %2451 = vst [vmem:[#allocation12_spill] sm:$0xff] %v1320_v51  ;;  %v1322_v52 = vld [vmem:[#allocation2 + $0x90] sm:$0xff]  ;;  %v1324_v53 = vld [vmem:[#allocation2 + $0x98] sm:$0xff]  ;;  %v1344_v63 = vmul.f32 %v1300_v38, %v1273_v32  ;;  %v263_v16 = vmul.f32 %v1316_v48, %v1215_v6  ;;  %v185_v17 = vmul.f32 %v1320_v51, %v1242_v15 }
  0x1a   :  { %2452 = vst [vmem:[#allocation13_spill] sm:$0xff] %v1322_v52  ;;  %2453 = vst [vmem:[#allocation14_spill] sm:$0xff] %v1324_v53  ;;  %v1334_v58 = vld [vmem:[#allocation2 + $0xa0] sm:$0xff]  ;;  %v1338_v61 = vld [vmem:[#allocation2 + $0xd8] sm:$0xff]  ;;  %v115_v8 = vadd.f32 %v114_v50, %v104_v39  ;;  %v186_v18 = vmul.f32 %v1322_v52, %v1261_v25  ;;  %v187_v26 = vmul.f32 %v1324_v53, %v1278_v33 }
  0x1b   :  { %2454 = vst [vmem:[#allocation15_spill] sm:$0xff] %v1334_v58  ;;  %2455 = vst [vmem:[#allocation16_spill] sm:$0xff] %v1338_v61  ;;  %v1346_v9 = vld [vmem:[#allocation2 + $0xa8] sm:$0xff]  ;;  %v1348_v10 = vld [vmem:[#allocation2 + $0xb0] sm:$0xff]  ;;  %v194_v27 = vadd.f32 %v193_v60, %v183_v44  ;;  %v188_v45 = vmul.f32 %v1334_v58, %v1283_v34  ;;  %v264_v48 = vmul.f32 %v1338_v61, %v1220_v7 }
  0x1c   :  { %2456 = vst [vmem:[#allocation17_spill] sm:$0xff] %v1346_v9  ;;  %2457 = vst [vmem:[#allocation18_spill] sm:$0xff] %v1348_v10  ;;  %v1358_v29 = vld [vmem:[#allocation2 + $0xe0] sm:$0xff]  ;;  %v1362_v36 = vld [vmem:[#allocation2 + $0x128] sm:$0xff]  ;;  %v116_v39 = vadd.f32 %v115_v8, %v105_v43  ;;  %v273_v52 = vadd.f32 %v262_v55, %v261_v54  ;;  %v189_v44 = vmul.f32 %v1346_v9, %v1288_v35 }
  0x1d   :  { %2458 = vst [vmem:[#allocation19_spill] sm:$0xff] %v1358_v29  ;;  %v1360_v30 = vld [vmem:[#allocation2 + $0x120] sm:$0xff]  ;;  %2460 = vst [vmem:[#allocation21_spill] sm:$0xff] %v1362_v36  ;;  %v1364_v40 = vld [vmem:[#allocation2 + $0xb8] sm:$0xff]  ;;  %v195_v60 = vadd.f32 %v194_v27, %v184_v59  ;;  %v343_v58 = vmul.f32 %v1362_v36, %v1210_v5  ;;  %v190_v54 = vmul.f32 %v1348_v10, %v1295_v37 }
  0x1e   :  { %2459 = vst [vmem:[#allocation20_spill] sm:$0xff] %v1360_v30  ;;  %2461 = vst [vmem:[#allocation22_spill] sm:$0xff] %v1364_v40  ;;  %v1368_v50 = vld [vmem:[#allocation2 + $0xe8] sm:$0xff]  ;;  %v1372_v53 = vld [vmem:[#allocation2 + $0x130] sm:$0xff]  ;;  %v342_v8 = vmul.f32 %v1360_v30, %v1205_v4  ;;  %v117_v47 = vadd.f32 %v116_v39, %v106_v49  ;;  %v265_v9 = vmul.f32 %v1358_v29, %v1233_v12 }
  0x1f   :  { %2462 = vst [vmem:[#allocation23_spill] sm:$0xff] %v1368_v50  ;;  %2463 = vst [vmem:[#allocation24_spill] sm:$0xff] %v1372_v53  ;;  %v1376_v51 = vld [vmem:[#allocation2 + $0xf0] sm:$0xff]  ;;  %v1378_v43 = vld [vmem:[#allocation2 + $0xf8] sm:$0xff]  ;;  %v274_v59 = vadd.f32 %v273_v52, %v263_v16  ;;  %v1394_v61 = vmul.f32 %v1364_v40, %v1300_v38  ;;  %v196_v30 = vadd.f32 %v195_v60, %v185_v17 }
  0x20   :  { %2464 = vst [vmem:[#allocation25_spill] sm:$0xff] %v1376_v51  ;;  %2465 = vst [vmem:[#allocation26_spill] sm:$0xff] %v1378_v43  ;;  %v1386_v55 = vld [vmem:[#allocation2 + $0x100] sm:$0xff]  ;;  %v1390_v27 = vld [vmem:[#allocation2 + $0x138] sm:$0xff]  ;;  %v266_v49 = vmul.f32 %v1368_v50, %v1242_v15  ;;  %v344_v36 = vmul.f32 %v1372_v53, %v1215_v6  ;;  %v118_v10 = vadd.f32 %v117_v47, %v107_v56 }
  0x21   :  { %2466 = vst [vmem:[#allocation27_spill] sm:$0xff] %v1386_v55  ;;  %v1396_v46 = vld [vmem:[#allocation2 + $0x108] sm:$0xff]  ;;  %v1400_v39 = vld [vmem:[#allocation2 + $0x140] sm:$0xff]  ;;  %v267_v52 = vmul.f32 %v1376_v51, %v1261_v25  ;;  %v268_v16 = vmul.f32 %v1378_v43, %v1278_v33  ;;  %v275_v40 = vadd.f32 %v274_v59, %v264_v48  ;;  %v197_v60 = vadd.f32 %v196_v30, %v186_v18  ;;  %v1412_v32 = vld [vmem:[#allocation2 + $0x110] sm:$0xff] }
  0x22   :  { %2467 = vst [vmem:[#allocation28_spill] sm:$0xff] %v1396_v46  ;;  %v1408_v29 = vld [vmem:[#allocation2 + $0x180] sm:$0xff]  ;;  %v1410_v17 = vld [vmem:[#allocation2 + $0x188] sm:$0xff]  ;;  %2470 = vst [vmem:[#allocation31_spill] sm:$0xff] %v1412_v32  ;;  %v269_v53 = vmul.f32 %v1386_v55, %v1283_v34  ;;  %v345_v47 = vmul.f32 %v1390_v27, %v1220_v7  ;;  %v354_v56 = vadd.f32 %v343_v58, %v342_v8 }
  0x23   :  { %2468 = vst [vmem:[#allocation29_spill] sm:$0xff] %v1408_v29  ;;  %2469 = vst [vmem:[#allocation30_spill] sm:$0xff] %v1410_v17  ;;  %v1414_v50 = vld [vmem:[#allocation2 + $0x118] sm:$0xff]  ;;  %v119_v51 = vadd.f32 %v118_v10, %v108_v57  ;;  %v270_v48 = vmul.f32 %v1396_v46, %v1288_v35  ;;  %v276_v59 = vadd.f32 %v275_v40, %v265_v9  ;;  %v1422_v43 = vld [vmem:[#allocation2 + $0x148] sm:$0xff] }
  0x24   :  { %2471 = vst [vmem:[#allocation32_spill] sm:$0xff] %v1414_v50  ;;  %v346_v18 = vmul.f32 %v1400_v39, %v1233_v12  ;;  %v1426_v30 = vld [vmem:[#allocation2 + $0x190] sm:$0xff]  ;;  %v198_v41 = vadd.f32 %v197_v60, %v187_v26  ;;  %v1430_v55 = vld [vmem:[#allocation2 + $0x158] sm:$0xff]  ;;  %v355_v28 = vadd.f32 %v354_v56, %v344_v36  ;;  %v423_v57 = vmul.f32 %v1408_v29, %v1205_v4  ;;  %v1444_v46 = vld [vmem:[#allocation2 + $0x160] sm:$0xff] }
  0x25   :  { %2472 = vst [vmem:[#allocation33_spill] sm:$0xff] %v1426_v30  ;;  %v1428_v31 = vld [vmem:[#allocation2 + $0x150] sm:$0xff]  ;;  %2474 = vst [vmem:[#allocation35_spill] sm:$0xff] %v1430_v55  ;;  %v424_v58 = vmul.f32 %v1410_v17, %v1210_v5  ;;  %v120_v9 = vadd.f32 %v119_v51, %v109_v62  ;;  %v271_v10 = vmul.f32 %v1412_v32, %v1295_v37  ;;  %v1442_v8 = vld [vmem:[#allocation2 + $0x198] sm:$0xff] }
  0x26   :  { %2473 = vst [vmem:[#allocation34_spill] sm:$0xff] %v1428_v31  ;;  %v1440_v40 = vmul.f32 %v1414_v50, %v1300_v38  ;;  %v277_v26 = vadd.f32 %v276_v59, %v266_v49  ;;  %2475 = vst [vmem:[#allocation36_spill] sm:$0xff] %v1442_v8  ;;  %v199_v60 = vadd.f32 %v198_v41, %v188_v45  ;;  %v1446_v36 = vld [vmem:[#allocation2 + $0x168] sm:$0xff]  ;;  %v1457_v45 = vld [vmem:[#allocation2 + $0x1a0] sm:$0xff] }
  0x27   :  { %2476 = vst [vmem:[#allocation37_spill] sm:$0xff] %v1444_v46  ;;  %2477 = vst [vmem:[#allocation38_spill] sm:$0xff] %v1446_v36  ;;  %v347_v56 = vmul.f32 %v1422_v43, %v1242_v15  ;;  %v356_v17 = vadd.f32 %v355_v28, %v345_v47  ;;  %v425_v51 = vmul.f32 %v1426_v30, %v1215_v6  ;;  %v1459_v29 = vld [vmem:[#allocation2 + $0x1a8] sm:$0xff]  ;;  %v1463_v30 = vld [vmem:[#allocation2 + $0x1e0] sm:$0xff] }
  0x28   :  { %v121_v62 = vadd.f32 %v120_v9, %v1344_v63  ;;  %v278_v32 = vadd.f32 %v277_v26, %v267_v52  ;;  %v348_v49 = vmul.f32 %v1428_v31, %v1261_v25  ;;  %v349_v41 = vmul.f32 %v1430_v55, %v1278_v33  ;;  %2478 = vst [vmem:[#allocation39_spill] sm:$0xff] %v1457_v45  ;;  %v1469_v55 = vld [vmem:[#allocation2 + $0x1e8] sm:$0xff] }
  0x29   :  { %v200_v59 = vadd.f32 %v199_v60, %v189_v44  ;;  %v357_v50 = vadd.f32 %v356_v17, %v346_v18  ;;  %2479 = vst [vmem:[#allocation40_spill] sm:$0xff] %v1459_v29  ;;  %v426_v28 = vmul.f32 %v1442_v8, %v1220_v7  ;;  %v435_v47 = vadd.f32 %v424_v58, %v423_v57  ;;  %v1471_v17 = vld [vmem:[#allocation2 + $0x170] sm:$0xff] }
  0x2a   :  { %v122_v63 = vrot.slane %v121_v62, 4  ;;  %v279_v52 = vadd.f32 %v278_v32, %v268_v16  ;;  %v350_v9 = vmul.f32 %v1444_v46, %v1283_v34  ;;  %v351_v26 = vmul.f32 %v1446_v36, %v1288_v35  ;;  %2480 = vst [vmem:[#allocation41_spill] sm:$0xff] %v1469_v55  ;;  %2481 = vst [vmem:[#allocation42_spill] sm:$0xff] %v1471_v17  ;;  %v1473_v60 = vld [vmem:[#allocation2 + $0x1b0] sm:$0xff] }
  0x2b   :  { %v201_v44 = vadd.f32 %v200_v59, %v190_v54  ;;  %v358_v18 = vadd.f32 %v357_v50, %v347_v56  ;;  %2482 = vst [vmem:[#allocation43_spill] sm:$0xff] %v1473_v60  ;;  %v427_v57 = vmul.f32 %v1457_v45, %v1233_v12  ;;  %v436_v58 = vadd.f32 %v435_v47, %v425_v51  ;;  %v1479_v46 = vld [vmem:[#allocation2 + $0x1f0] sm:$0xff]  ;;  %v1484_v59 = vld [vmem:[#allocation2 + $0x178] sm:$0xff] }
  0x2c   :  { %v123_v8 = vadd.f32 %v122_v63, %v121_v62  ;;  %v280_v32 = vadd.f32 %v279_v52, %v269_v53  ;;  %v428_v16 = vmul.f32 %v1459_v29, %v1242_v15  ;;  %2483 = vst [vmem:[#allocation44_spill] sm:$0xff] %v1479_v46  ;;  %v504_v36 = vmul.f32 %v1463_v30, %v1205_v4  ;;  %v1486_v56 = vld [vmem:[#allocation2 + $0x1b8] sm:$0xff] }
  0x2d   :  { %v202_v54 = vadd.f32 %v201_v44, %v1394_v61  ;;  %2484 = vst [vmem:[#allocation45_spill] sm:$0xff] %v1484_v59  ;;  %v359_v50 = vadd.f32 %v358_v18, %v348_v49  ;;  %2485 = vst [vmem:[#allocation46_spill] sm:$0xff] %v1486_v56  ;;  %v437_v31 = vadd.f32 %v436_v58, %v426_v28  ;;  %v1488_v45 = vld [vmem:[#allocation2 + $0x1f8] sm:$0xff]  ;;  %v1496_v44 = vld [vmem:[#allocation2 + $0x1c0] sm:$0xff] }
  0x2e   :  { %2486 = vst [vmem:[#allocation47_spill] sm:$0xff] %v1488_v45  ;;  %v505_v53 = vmul.f32 %v1469_v55, %v1210_v5  ;;  %v124_v51 = vrot.slane %v123_v8, 2  ;;  %v281_v62 = vadd.f32 %v280_v32, %v270_v48  ;;  %v352_v47 = vmul.f32 %v1471_v17, %v1295_v37  ;;  %v1498_v18 = vld [vmem:[#allocation2 + $0x200] sm:$0xff] }
  0x2f   :  { %v429_v63 = vmul.f32 %v1473_v60, %v1261_v25  ;;  %v203_v61 = vrot.slane %v202_v54, 4  ;;  %v360_v52 = vadd.f32 %v359_v50, %v349_v41  ;;  %v438_v49 = vadd.f32 %v437_v31, %v427_v57  ;;  %2487 = vst [vmem:[#allocation48_spill] sm:$0xff] %v1498_v18  ;;  %v1508_v50 = vld [vmem:[#allocation2 + $0x1c8] sm:$0xff] }
  0x30   :  { %v506_v28 = vmul.f32 %v1479_v46, %v1215_v6  ;;  %v282_v58 = vadd.f32 %v281_v62, %v271_v10  ;;  %v353_v48 = vmul.f32 %v1484_v59, %v1300_v38  ;;  %v430_v32 = vmul.f32 %v1486_v56, %v1278_v33  ;;  %2488 = vst [vmem:[#allocation49_spill] sm:$0xff] %v1508_v50  ;;  %v1510_v57 = vld [vmem:[#allocation2 + $0x208] sm:$0xff] }
  0x31   :  { %v507_v60 = vmul.f32 %v1488_v45, %v1220_v7  ;;  %v204_v17 = vadd.f32 %v203_v61, %v202_v54  ;;  %v361_v41 = vadd.f32 %v360_v52, %v350_v9  ;;  %v439_v31 = vadd.f32 %v438_v49, %v428_v16  ;;  %2489 = vst [vmem:[#allocation50_spill] sm:$0xff] %v1510_v57  ;;  %v1517_v45 = vld [vmem:[#allocation2 + $0x1d0] sm:$0xff]  ;;  %v1519_v9 = vld [vmem:[#allocation2 + $0x1d8] sm:$0xff] }
  0x32   :  { %v516_v29 = vadd.f32 %v505_v53, %v504_v36  ;;  %v125_v55 = vadd.f32 %v124_v51, %v123_v8  ;;  %v283_v10 = vadd.f32 %v282_v58, %v1440_v40  ;;  %v431_v62 = vmul.f32 %v1496_v44, %v1283_v34  ;;  %2490 = vst [vmem:[#allocation51_spill] sm:$0xff] %v1517_v45  ;;  %v1524_v8 = vld [vmem:[#allocation2 + $0x210] sm:$0xff]  ;;  %v1528_v52 = vld [vmem:[#allocation2 + $0x218] sm:$0xff]  ;;  %v1530_v58 = vld [vmem:[#allocation2 + $0x240] sm:$0xff] }
  0x33   :  { %v508_v56 = vmul.f32 %v1498_v18, %v1233_v12  ;;  %v205_v46 = vrot.slane %v204_v17, 2  ;;  %v362_v59 = vadd.f32 %v361_v41, %v351_v26  ;;  %2491 = vst [vmem:[#allocation52_spill] sm:$0xff] %v1519_v9  ;;  %v440_v54 = vadd.f32 %v439_v31, %v429_v63  ;;  %2492 = vst [vmem:[#allocation53_spill] sm:$0xff] %v1524_v8 }
  0x34   :  { %v517_v16 = vadd.f32 %v516_v29, %v506_v28  ;;  %v284_v36 = vrot.slane %v283_v10, 4  ;;  %v432_v40 = vmul.f32 %v1508_v50, %v1288_v35  ;;  %v509_v53 = vmul.f32 %v1510_v57, %v1242_v15  ;;  %2493 = vst [vmem:[#allocation54_spill] sm:$0xff] %v1528_v52  ;;  %2494 = vst [vmem:[#allocation55_spill] sm:$0xff] %v1530_v58  ;;  %v1532_v29 = vld [vmem:[#allocation2 + $0x248] sm:$0xff]  ;;  %v1566_v50 = vld [vmem:[#allocation2 + $0x260] sm:$0xff] }
  0x35   :  { %v206_v51 = vadd.f32 %v205_v46, %v204_v17  ;;  %v363_v61 = vadd.f32 %v362_v59, %v352_v47  ;;  %v441_v26 = vadd.f32 %v440_v54, %v430_v32  ;;  %2495 = vst [vmem:[#allocation56_spill] sm:$0xff] %v1532_v29  ;;  %v126_v63 = vrot.slane %v125_v55, 1  ;;  %v1539_v59 = vld [vmem:[#allocation2 + $0x220] sm:$0xff]  ;;  %v1543_v32 = vld [vmem:[#allocation2 + $0x250] sm:$0xff]  ;;  %2501 = vst [vmem:[#allocation62_spill] sm:$0xff] %v1566_v50 }
  0x36   :  { %v518_v49 = vadd.f32 %v517_v16, %v507_v60  ;;  %v285_v28 = vadd.f32 %v284_v36, %v283_v10  ;;  %v433_v41 = vmul.f32 %v1517_v45, %v1295_v37  ;;  %v434_v31 = vmul.f32 %v1519_v9, %v1300_v38  ;;  %2496 = vst [vmem:[#allocation57_spill] sm:$0xff] %v1539_v59  ;;  %v1545_v16 = vld [vmem:[#allocation2 + $0x228] sm:$0xff]  ;;  %v1553_v9 = vld [vmem:[#allocation2 + $0x230] sm:$0xff] }
  0x37   :  { %v364_v46 = vadd.f32 %v363_v61, %v353_v48  ;;  %v442_v17 = vadd.f32 %v441_v26, %v431_v62  ;;  %v510_v60 = vmul.f32 %v1524_v8, %v1261_v25  ;;  %2497 = vst [vmem:[#allocation58_spill] sm:$0xff] %v1545_v16  ;;  %v511_v10 = vmul.f32 %v1528_v52, %v1278_v33  ;;  %v1557_v8 = vld [vmem:[#allocation2 + $0x258] sm:$0xff] }
  0x38   :  { %v519_v47 = vadd.f32 %v518_v49, %v508_v56  ;;  %v286_v54 = vrot.slane %v285_v28, 2  ;;  %v585_v36 = vmul.f32 %v1530_v58, %v1205_v4  ;;  %v586_v48 = vmul.f32 %v1532_v29, %v1210_v5  ;;  %2498 = vst [vmem:[#allocation59_spill] sm:$0xff] %v1553_v9  ;;  %v1555_v56 = vld [vmem:[#allocation2 + $0x238] sm:$0xff]  ;;  %2500 = vst [vmem:[#allocation61_spill] sm:$0xff] %v1557_v8 }
  0x39   :  { %v207_v62 = vrot.slane %v206_v51, 1  ;;  %v365_v61 = vrot.slane %v364_v46, 4  ;;  %v443_v26 = vadd.f32 %v442_v17, %v432_v40  ;;  %2499 = vst [vmem:[#allocation60_spill] sm:$0xff] %v1555_v56  ;;  %v127_v57 = vadd.f32 %v126_v63, %v125_v55  ;;  %v1572_v63 = vld [vmem:[#allocation2 + $0x268] sm:$0xff] }
  0x3a   :  { %v520_v49 = vadd.f32 %v519_v47, %v509_v53  ;;  %v287_v45 = vadd.f32 %v286_v54, %v285_v28  ;;  %v512_v52 = vmul.f32 %v1539_v59, %v1283_v34  ;;  %v587_v58 = vmul.f32 %v1543_v32, %v1215_v6  ;;  %2502 = vst [vmem:[#allocation63_spill] sm:$0xff] %v1572_v63 }
  0x3b   :  { %v366_v29 = vadd.f32 %v365_v61, %v364_v46  ;;  %v444_v18 = vadd.f32 %v443_v26, %v433_v41  ;;  %v513_v40 = vmul.f32 %v1545_v16, %v1288_v35  ;;  %v514_v55 = vmul.f32 %v1553_v9, %v1295_v37  ;;  %v1576_v26 = vld [vmem:[#allocation2 + $0x270] sm:$0xff]  ;;  %v1584_v16 = vld [vmem:[#allocation2 + $0x278] sm:$0xff] }
  0x3c   :  { %v521_v17 = vadd.f32 %v520_v49, %v510_v60  ;;  %v515_v53 = vmul.f32 %v1555_v56, %v1300_v38  ;;  %v588_v28 = vmul.f32 %v1557_v8, %v1220_v7  ;;  %v597_v47 = vadd.f32 %v586_v48, %v585_v36  ;;  %2503 = vst [vmem:[#allocation64_spill] sm:$0xff] %v1576_v26  ;;  %v1578_v60 = vld [vmem:[#allocation2 + $0x2a0] sm:$0xff]  ;;  %v1580_v49 = vld [vmem:[#allocation2 + $0x2a8] sm:$0xff]  ;;  %v1591_v48 = vld [vmem:[#allocation2 + $0x2b0] sm:$0xff] }
  0x3d   :  { %v208_v46 = vadd.f32 %v207_v62, %v206_v51  ;;  %v367_v41 = vrot.slane %v366_v29, 2  ;;  %v445_v54 = vadd.f32 %v444_v18, %v434_v31  ;;  %2504 = vst [vmem:[#allocation65_spill] sm:$0xff] %v1578_v60  ;;  %v134_v9 = vsel %vm128_vm0, %v127_v57, 0.0  ;;  %2505 = vst [vmem:[#allocation66_spill] sm:$0xff] %v1584_v16  ;;  %v1593_v62 = vld [vmem:[#allocation2 + $0x280] sm:$0xff]  ;;  %v1595_v57 = vld [vmem:[#allocation2 + $0x288] sm:$0xff] }
  0x3e   :  { %v522_v61 = vadd.f32 %v521_v17, %v511_v10  ;;  %v288_v56 = vrot.slane %v287_v45, 1  ;;  %v589_v8 = vmul.f32 %v1566_v50, %v1233_v12  ;;  %v598_v36 = vadd.f32 %v597_v47, %v587_v58  ;;  %2506 = vst [vmem:[#allocation67_spill] sm:$0xff] %v1593_v62  ;;  %2507 = vst [vmem:[#allocation68_spill] sm:$0xff] %v1595_v57  ;;  %v1609_v50 = vld [vmem:[#allocation2 + $0x2b8] sm:$0xff] }
  0x3f   :  { %v368_v51 = vadd.f32 %v367_v41, %v366_v29  ;;  %v446_v18 = vrot.slane %v445_v54, 4  ;;  %v590_v10 = vmul.f32 %v1572_v63, %v1242_v15  ;;  %v591_v17 = vmul.f32 %v1576_v26, %v1261_v25 }
  0x40   :  { %v523_v31 = vadd.f32 %v522_v61, %v512_v52  ;;  %v599_v59 = vadd.f32 %v598_v36, %v588_v28  ;;  %v666_v58 = vmul.f32 %v1578_v60, %v1205_v4  ;;  %v667_v29 = vmul.f32 %v1580_v49, %v1210_v5  ;;  %v1605_v61 = vld [vmem:[#allocation2 + $0x290] sm:$0xff]  ;;  %v1611_v36 = vld [vmem:[#allocation2 + $0x298] sm:$0xff]  ;;  %v1613_v60 = vld [vmem:[#allocation2 + $0x2c0] sm:$0xff] }
  0x41   :  { %v215_v52 = vsel %vm209_vm1, %v208_v46, 0.0  ;;  %v447_v47 = vadd.f32 %v446_v18, %v445_v54  ;;  %2508 = vst [vmem:[#allocation69_spill] sm:$0xff] %v1605_v61  ;;  %v592_v63 = vmul.f32 %v1584_v16, %v1278_v33  ;;  %v289_v26 = vadd.f32 %v288_v56, %v287_v45 }
  0x42   :  { %v524_v41 = vadd.f32 %v523_v31, %v513_v40  ;;  %v369_v28 = vrot.slane %v368_v51, 1  ;;  %v600_v4 = vadd.f32 %v599_v59, %v589_v8  ;;  %v668_v5 = vmul.f32 %v1591_v48, %v1215_v6  ;;  %v1628_v6 = vld [vmem:[%s2342_s0] sm:$0xff] }
  0x43   :  { %v448_v46 = vrot.slane %v447_v47, 2  ;;  %v593_v40 = vmul.f32 %v1593_v62, %v1283_v34  ;;  %v594_v18 = vmul.f32 %v1595_v57, %v1288_v35  ;;  %v595_v45 = vmul.f32 %v1605_v61, %v1295_v37  ;;  %v1645_v62 = vld [vmem:[#allocation2 + $0x2d8] sm:$0xff] }
  0x44   :  { %v525_v54 = vadd.f32 %v524_v41, %v514_v55  ;;  %v601_v56 = vadd.f32 %v600_v4, %v590_v10  ;;  %v669_v8 = vmul.f32 %v1609_v50, %v1220_v7  ;;  %v678_v59 = vadd.f32 %v667_v29, %v666_v58  ;;  %v1633_v55 = vld [vmem:[%s2342_s0 + $0x8] sm:$0xff]  ;;  %v1639_v4 = vld [vmem:[#allocation2 + $0x2d0] sm:$0xff] }
  0x45   :  { %v217_v31 = vadd.f32 %v215_v52, %v134_v9  ;;  %v596_v61 = vmul.f32 %v1611_v36, %v1300_v38  ;;  %v1637_v10 = vld [vmem:[#allocation2 + $0x2c8] sm:$0xff]  ;;  %v670_v7 = vmul.f32 %v1613_v60, %v1233_v12  ;;  %v296_v58 = vsel %vm290_vm2, %v289_v26, 0.0  ;;  %v1650_v9 = vld [vmem:[%s2342_s0 + $0x10] sm:$0xff] }
  0x46   :  { %v526_v41 = vadd.f32 %v525_v54, %v515_v53  ;;  %v370_v29 = vadd.f32 %v369_v28, %v368_v51  ;;  %v602_v57 = vadd.f32 %v601_v56, %v591_v17  ;;  %v679_v16 = vadd.f32 %v678_v59, %v668_v5  ;;  %v1652_v54 = vld [vmem:[#allocation2 + $0x2e0] sm:$0xff]  ;;  %v1659_v17 = vld [vmem:[#allocation2 + $0x2e8] sm:$0xff] }
  0x47   :  { %v449_v53 = vadd.f32 %v448_v46, %v447_v47  ;;  %v58_v12 = vmul.f32 %v1628_v6, %v1194_v0  ;;  %v59_v26 = vmul.f32 %v1633_v55, %v1196_v1  ;;  %2509 = vst [vmem:[#allocation70_spill] sm:$0xff] %v1659_v17  ;;  %v671_v28 = vmul.f32 %v1637_v10, %v1242_v15  ;;  %v1668_v46 = vld [vmem:[%s2342_s0 + $0x18] sm:$0xff]  ;;  %v1670_v1 = vld [vmem:[#allocation2 + $0x2f0] sm:$0xff] }
  0x48   :  { %v527_v52 = vrot.slane %v526_v41, 4  ;;  %v603_v51 = vadd.f32 %v602_v57, %v592_v63  ;;  %v672_v47 = vmul.f32 %v1639_v4, %v1261_v25  ;;  %v680_v5 = vadd.f32 %v679_v16, %v669_v8  ;;  %2510 = vst [vmem:[#allocation71_spill] sm:$0xff] %v1670_v1  ;;  %v1678_v16 = vld [vmem:[#allocation2 + $0x2f8] sm:$0xff] }
  0x49   :  { %v298_v0 = vadd.f32 %v296_v58, %v217_v31  ;;  %v673_v63 = vmul.f32 %v1645_v62, %v1278_v33  ;;  %v60_v57 = vmul.f32 %v1650_v9, %v1198_v2  ;;  %v377_v15 = vsel %vm371_vm3, %v370_v29, 0.0  ;;  %2511 = vst [vmem:[#allocation72_spill] sm:$0xff] %v1678_v16  ;;  %v1685_v31 = vld [vmem:[%s2342_s0 + $0x20] sm:$0xff] }
  0x4a   :  { %v528_v56 = vadd.f32 %v527_v52, %v526_v41  ;;  %v604_v25 = vadd.f32 %v603_v51, %v593_v40  ;;  %v674_v8 = vmul.f32 %v1652_v54, %v1283_v34  ;;  %v681_v59 = vadd.f32 %v680_v5, %v670_v7  ;;  %v1696_v7 = vld [vmem:[%s2342_s0 + $0x28] sm:$0xff]  ;;  %v1701_v51 = vld [vmem:[%s2342_s0 + $0x30] sm:$0xff]  ;;  %v1715_v5 = vld [vmem:[%s2342_s0 + $0x40] sm:$0xff] }
  0x4b   :  { %v450_v41 = vrot.slane %v449_v53, 1  ;;  %v675_v33 = vmul.f32 %v1659_v17, %v1288_v35  ;;  %v61_v2 = vmul.f32 %v1668_v46, %v1200_v3  ;;  %v70_v58 = vadd.f32 %v59_v26, %v58_v12  ;;  %2512 = vst [vmem:[#allocation73_spill] sm:$0xff] %v1715_v5 }
  0x4c   :  { %v529_v40 = vrot.slane %v528_v56, 2  ;;  %v605_v29 = vadd.f32 %v604_v25, %v594_v18  ;;  %v676_v52 = vmul.f32 %v1670_v1, %v1295_v37  ;;  %v682_v34 = vadd.f32 %v681_v59, %v671_v28  ;;  %v1710_v28 = vld [vmem:[%s2342_s0 + $0x38] sm:$0xff] }
  0x4d   :  { %v379_v35 = vadd.f32 %v377_v15, %v298_v0  ;;  %v677_v3 = vmul.f32 %v1678_v16, %v1300_v38  ;;  %v62_v18 = vmul.f32 %v1685_v31, %v1228_v11  ;;  %v71_v12 = vadd.f32 %v70_v58, %v60_v57  ;;  %v1720_v38 = vld [vmem:[%s2342_s0 + $0x48] sm:$0xff] }
  0x4e   :  { %v606_v37 = vadd.f32 %v605_v29, %v595_v45  ;;  %v683_v26 = vadd.f32 %v682_v34, %v672_v47  ;;  %2513 = vst [vmem:[#allocation74_spill] sm:$0xff] %v1720_v38  ;;  %v151_v11 = vmul.f32 %v1248_v20, %v1628_v6  ;;  %v152_v45 = vmul.f32 %v1250_v21, %v1633_v55  ;;  %v1733_v29 = vld [vmem:[%s2342_s0 + $0x50] sm:$0xff] }
  0x4f   :  { %v451_v47 = vadd.f32 %v450_v41, %v449_v53  ;;  %v63_v0 = vmul.f32 %v1696_v7, %v1235_v13  ;;  %v64_v57 = vmul.f32 %v1701_v51, %v1237_v14  ;;  %v72_v15 = vadd.f32 %v71_v12, %v61_v2  ;;  %2514 = vst [vmem:[#allocation75_spill] sm:$0xff] %v1733_v29 }
  0x50   :  { %v530_v25 = vadd.f32 %v529_v40, %v528_v56  ;;  %v607_v59 = vadd.f32 %v606_v37, %v596_v61  ;;  %v684_v58 = vadd.f32 %v683_v26, %v673_v63  ;;  %v153_v20 = vmul.f32 %v1252_v22, %v1650_v9  ;;  %v1747_v63 = vld [vmem:[%s2342_s0 + $0x58] sm:$0xff]  ;;  %v2516_v22 = vld [vmem:[#allocation5_spill] sm:$0xff]  ;;  %v2517_v40 = vld [vmem:[#allocation6_spill] sm:$0xff] }
  0x51   :  { %v65_v13 = vmul.f32 %v1710_v28, %v1246_v19  ;;  %v66_v14 = vmul.f32 %v1715_v5, %v1254_v23  ;;  %v67_v21 = vmul.f32 %v1720_v38, %v1256_v24  ;;  %v73_v61 = vadd.f32 %v72_v15, %v62_v18  ;;  %2515 = vst [vmem:[#allocation76_spill] sm:$0xff] %v1747_v63  ;;  %v2518_v24 = vld [vmem:[#allocation8_spill] sm:$0xff]  ;;  %v2519_v15 = vld [vmem:[#allocation7_spill] sm:$0xff] }
  0x52   :  { %v608_v53 = vrot.slane %v607_v59, 4  ;;  %v685_v56 = vadd.f32 %v684_v58, %v674_v8  ;;  %v154_v41 = vmul.f32 %v2516_v22, %v1668_v46  ;;  %v163_v2 = vadd.f32 %v152_v45, %v151_v11  ;;  %v2520_v45 = vld [vmem:[#allocation9_spill] sm:$0xff]  ;;  %v2521_v22 = vld [vmem:[#allocation10_spill] sm:$0xff] }
  0x53   :  { %v458_v19 = vsel %vm452_vm4, %v451_v47, 0.0  ;;  %v68_v23 = vmul.f32 %v1733_v29, %v2517_v40  ;;  %v74_v34 = vadd.f32 %v73_v61, %v63_v0  ;;  %v155_v18 = vmul.f32 %v2518_v24, %v1685_v31  ;;  %v2522_v24 = vld [vmem:[#allocation12_spill] sm:$0xff] }
  0x54   :  { %v531_v8 = vrot.slane %v530_v25, 1  ;;  %v609_v12 = vadd.f32 %v608_v53, %v607_v59  ;;  %v686_v37 = vadd.f32 %v685_v56, %v675_v33  ;;  %v164_v26 = vadd.f32 %v163_v2, %v153_v20  ;;  %v2523_v53 = vld [vmem:[#allocation13_spill] sm:$0xff]  ;;  %v2524_v2 = vld [vmem:[#allocation11_spill] sm:$0xff] }
  0x55   :  { %v69_v58 = vmul.f32 %v1747_v63, %v2519_v15  ;;  %v75_v11 = vadd.f32 %v74_v34, %v64_v57  ;;  %v232_v47 = vmul.f32 %v2520_v45, %v1628_v6  ;;  %v233_v40 = vmul.f32 %v2521_v22, %v1633_v55  ;;  %v2525_v22 = vld [vmem:[#allocation14_spill] sm:$0xff] }
  0x56   :  { %v610_v0 = vrot.slane %v609_v12, 2  ;;  %v687_v61 = vadd.f32 %v686_v37, %v676_v52  ;;  %v156_v16 = vmul.f32 %v2522_v24, %v1696_v7  ;;  %v165_v59 = vadd.f32 %v164_v26, %v154_v41  ;;  %v2526_v37 = vld [vmem:[#allocation16_spill] sm:$0xff] }
  0x57   :  { %v460_v33 = vadd.f32 %v458_v19, %v379_v35  ;;  %v76_v20 = vadd.f32 %v75_v11, %v65_v13  ;;  %v157_v56 = vmul.f32 %v2523_v53, %v1701_v51  ;;  %v234_v57 = vmul.f32 %v2524_v2, %v1650_v9  ;;  %v2527_v19 = vld [vmem:[#allocation15_spill] sm:$0xff] }
  0x58   :  { %v532_v34 = vadd.f32 %v531_v8, %v530_v25  ;;  %v611_v15 = vadd.f32 %v610_v0, %v609_v12  ;;  %v688_v45 = vadd.f32 %v687_v61, %v677_v3  ;;  %v166_v1 = vadd.f32 %v165_v59, %v155_v18  ;;  %v2528_v3 = vld [vmem:[#allocation17_spill] sm:$0xff] }
  0x59   :  { %v77_v17 = vadd.f32 %v76_v20, %v66_v14  ;;  %v158_v52 = vmul.f32 %v2525_v22, %v1710_v28  ;;  %v235_v24 = vmul.f32 %v2526_v37, %v1668_v46  ;;  %v244_v41 = vadd.f32 %v233_v40, %v232_v47  ;;  %v2529_v14 = vld [vmem:[#allocation19_spill] sm:$0xff]  ;;  %v2530_v20 = vld [vmem:[#allocation18_spill] sm:$0xff]  ;;  %v2532_v22 = vld [vmem:[#allocation20_spill] sm:$0xff] }
  0x5a   :  { %v612_v35 = vrot.slane %v611_v15, 1  ;;  %v689_v13 = vrot.slane %v688_v45, 4  ;;  %v159_v26 = vmul.f32 %v2527_v19, %v1715_v5  ;;  %v167_v11 = vadd.f32 %v166_v1, %v156_v16  ;;  %v2531_v16 = vld [vmem:[#allocation23_spill] sm:$0xff] }
  0x5b   :  { %v78_v25 = vadd.f32 %v77_v17, %v67_v21  ;;  %v160_v18 = vmul.f32 %v2528_v3, %v1720_v38  ;;  %v236_v8 = vmul.f32 %v2529_v14, %v1685_v31  ;;  %v245_v12 = vadd.f32 %v244_v41, %v234_v57  ;;  %v2533_v57 = vld [vmem:[#allocation21_spill] sm:$0xff]  ;;  %v2537_v14 = vld [vmem:[#allocation26_spill] sm:$0xff] }
  0x5c   :  { %v539_v0 = vsel %vm533_vm5, %v532_v34, 0.0  ;;  %v613_v47 = vadd.f32 %v612_v35, %v611_v15  ;;  %v690_v40 = vadd.f32 %v689_v13, %v688_v45  ;;  %v168_v61 = vadd.f32 %v167_v11, %v157_v56  ;;  %v2534_v56 = vld [vmem:[#allocation25_spill] sm:$0xff] }
  0x5d   :  { %v79_v59 = vadd.f32 %v78_v25, %v68_v23  ;;  %v161_v1 = vmul.f32 %v2530_v20, %v1733_v29  ;;  %v237_v17 = vmul.f32 %v2531_v16, %v1696_v7  ;;  %v246_v21 = vadd.f32 %v245_v12, %v235_v24  ;;  %v2535_v24 = vld [vmem:[#allocation24_spill] sm:$0xff]  ;;  %v2536_v25 = vld [vmem:[#allocation22_spill] sm:$0xff] }
  0x5e   :  { %v691_v53 = vrot.slane %v690_v40, 2  ;;  %v169_v2 = vadd.f32 %v168_v61, %v158_v52  ;;  %v313_v37 = vmul.f32 %v2532_v22, %v1628_v6  ;;  %v314_v41 = vmul.f32 %v2533_v57, %v1633_v55 }
  0x5f   :  { %v541_v34 = vadd.f32 %v539_v0, %v460_v33  ;;  %v80_v15 = vadd.f32 %v79_v59, %v69_v58  ;;  %v238_v23 = vmul.f32 %v2534_v56, %v1701_v51  ;;  %v247_v45 = vadd.f32 %v246_v21, %v236_v8 }
  0x60   :  { %v620_v35 = vsel %vm614_vm6, %v613_v47, 0.0  ;;  %v692_v13 = vadd.f32 %v691_v53, %v690_v40  ;;  %v170_v19 = vadd.f32 %v169_v2, %v159_v26  ;;  %v315_v52 = vmul.f32 %v2535_v24, %v1650_v9  ;;  %v2538_v26 = vld [vmem:[#allocation27_spill] sm:$0xff] }
  0x61   :  { %v81_v11 = vrot.slane %v80_v15, 4  ;;  %v162_v3 = vmul.f32 %v2536_v25, %v1747_v63  ;;  %v239_v33 = vmul.f32 %v2537_v14, %v1710_v28  ;;  %v248_v58 = vadd.f32 %v247_v45, %v237_v17  ;;  %v2539_v17 = vld [vmem:[#allocation28_spill] sm:$0xff] }
  0x62   :  { %v693_v12 = vrot.slane %v692_v13, 1  ;;  %v171_v0 = vadd.f32 %v170_v19, %v160_v18  ;;  %v316_v8 = vmul.f32 %v1390_v27, %v1668_v46  ;;  %v325_v61 = vadd.f32 %v314_v41, %v313_v37  ;;  %v2540_v37 = vld [vmem:[#allocation29_spill] sm:$0xff] }
  0x63   :  { %v622_v47 = vadd.f32 %v620_v35, %v541_v34  ;;  %v240_v40 = vmul.f32 %v2538_v26, %v1715_v5  ;;  %v249_v59 = vadd.f32 %v248_v58, %v238_v23  ;;  %v317_v20 = vmul.f32 %v1400_v39, %v1685_v31  ;;  %v2541_v39 = vld [vmem:[#allocation30_spill] sm:$0xff]  ;;  %v2542_v23 = vld [vmem:[#allocation31_spill] sm:$0xff] }
  0x64   :  { %v694_v16 = vadd.f32 %v693_v12, %v692_v13  ;;  %v82_v21 = vadd.f32 %v81_v11, %v80_v15  ;;  %v172_v53 = vadd.f32 %v171_v0, %v161_v1  ;;  %v326_v2 = vadd.f32 %v325_v61, %v315_v52  ;;  %v2543_v13 = vld [vmem:[#allocation34_spill] sm:$0xff]  ;;  %v2544_v11 = vld [vmem:[#allocation33_spill] sm:$0xff]  ;;  %v2546_v58 = vld [vmem:[#allocation35_spill] sm:$0xff] }
  0x65   :  { %v241_v22 = vmul.f32 %v2539_v17, %v1720_v38  ;;  %v250_v18 = vadd.f32 %v249_v59, %v239_v33  ;;  %v318_v27 = vmul.f32 %v1422_v43, %v1696_v7  ;;  %v394_v57 = vmul.f32 %v2540_v37, %v1628_v6  ;;  %v2547_v61 = vld [vmem:[#allocation36_spill] sm:$0xff]  ;;  %v2548_v59 = vld [vmem:[#allocation37_spill] sm:$0xff] }
  0x66   :  { %v701_v41 = vsel %vm695_vm7, %v694_v16, 0.0  ;;  %v173_v34 = vadd.f32 %v172_v53, %v162_v3  ;;  %v327_v56 = vadd.f32 %v326_v2, %v316_v8  ;;  %v395_v15 = vmul.f32 %v2541_v39, %v1633_v55  ;;  %v2545_v3 = vld [vmem:[#allocation32_spill] sm:$0xff]  ;;  %v2549_v16 = vld [vmem:[#allocation39_spill] sm:$0xff] }
  0x67   :  { %v703_v1 = vadd.f32 %v701_v41, %v622_v47  ;;  %v242_v45 = vmul.f32 %v2542_v23, %v1733_v29  ;;  %v251_v35 = vadd.f32 %v250_v18, %v240_v40  ;;  %v319_v19 = vmul.f32 %v2543_v13, %v1701_v51  ;;  %v2550_v41 = vld [vmem:[#allocation38_spill] sm:$0xff] }
  0x68   :  { %v83_v43 = vrot.slane %v82_v21, 2  ;;  %v174_v24 = vrot.slane %v173_v34, 4  ;;  %v328_v52 = vadd.f32 %v327_v56, %v317_v20  ;;  %v396_v25 = vmul.f32 %v2544_v11, %v1650_v9 }
  0x69   :  { %1037 = vadd.xlane.f32.xlu1 %v703_v1  ;;  %v243_v14 = vmul.f32 %v2545_v3, %v1747_v63  ;;  %v252_v33 = vadd.f32 %v251_v35, %v241_v22  ;;  %v320_v12 = vmul.f32 %v2546_v58, %v1710_v28  ;;  %v397_v47 = vmul.f32 %v2547_v61, %v1668_v46  ;;  %v2552_v1 = vld [vmem:[#allocation40_spill] sm:$0xff]  ;;  %v2553_v35 = vld [vmem:[#allocation42_spill] sm:$0xff] }
  0x6a   :  { %v175_v0 = vadd.f32 %v174_v24, %v173_v34  ;;  %v329_v8 = vadd.f32 %v328_v52, %v318_v27  ;;  %v406_v26 = vadd.f32 %v395_v15, %v394_v57  ;;  %v321_v20 = vmul.f32 %v2548_v59, %v1715_v5  ;;  %v2551_v57 = vld [vmem:[#allocation41_spill] sm:$0xff]  ;;  %v2555_v24 = vld [vmem:[#allocation44_spill] sm:$0xff]  ;;  %v2557_v58 = vld [vmem:[#allocation46_spill] sm:$0xff] }
  0x6b   :  { %v253_v40 = vadd.f32 %v252_v33, %v242_v45  ;;  %v398_v53 = vmul.f32 %v2549_v16, %v1685_v31  ;;  %v84_v2 = vadd.f32 %v83_v43, %v82_v21  ;;  %v322_v34 = vmul.f32 %v2550_v41, %v1720_v38 }
  0x6c   :  { %v176_v17 = vrot.slane %v175_v0, 2  ;;  %v330_v18 = vadd.f32 %v329_v8, %v319_v19  ;;  %v407_v22 = vadd.f32 %v406_v26, %v396_v25  ;;  %v475_v27 = vmul.f32 %v1463_v30, %v1628_v6  ;;  %v2554_v19 = vld [vmem:[#allocation45_spill] sm:$0xff]  ;;  %v2556_v25 = vld [vmem:[#allocation43_spill] sm:$0xff] }
  0x6d   :  { %v254_v37 = vadd.f32 %v253_v40, %v243_v14  ;;  %v476_v56 = vmul.f32 %v2551_v57, %v1633_v55  ;;  %v399_v23 = vmul.f32 %v2552_v1, %v1696_v7  ;;  %v323_v13 = vmul.f32 %v2553_v35, %v1733_v29  ;;  %v2561_v57 = vld [vmem:[#allocation51_spill] sm:$0xff] }
  0x6e   :  { %v177_v39 = vadd.f32 %v176_v17, %v175_v0  ;;  %v331_v15 = vadd.f32 %v330_v18, %v320_v12  ;;  %v408_v45 = vadd.f32 %v407_v22, %v397_v47  ;;  %v324_v43 = vmul.f32 %v2554_v19, %v1747_v63  ;;  %v2558_v0 = vld [vmem:[#allocation47_spill] sm:$0xff] }
  0x6f   :  { %v255_v21 = vrot.slane %v254_v37, 4  ;;  %v477_v52 = vmul.f32 %v2555_v24, %v1650_v9  ;;  %v85_v30 = vrot.slane %v84_v2, 1  ;;  %v400_v3 = vmul.f32 %v2556_v25, %v1701_v51  ;;  %v2565_v24 = vld [vmem:[#allocation52_spill] sm:$0xff] }
  0x70   :  { %v332_v11 = vadd.f32 %v331_v15, %v321_v20  ;;  %v409_v14 = vadd.f32 %v408_v45, %v398_v53  ;;  %v401_v12 = vmul.f32 %v2557_v58, %v1710_v28  ;;  %v478_v8 = vmul.f32 %v2558_v0, %v1668_v46  ;;  %v2559_v20 = vld [vmem:[#allocation49_spill] sm:$0xff]  ;;  %v2560_v53 = vld [vmem:[#allocation48_spill] sm:$0xff] }
  0x71   :  { %v256_v33 = vadd.f32 %v255_v21, %v254_v37  ;;  %v487_v61 = vadd.f32 %v476_v56, %v475_v27  ;;  %v178_v47 = vrot.slane %v177_v39, 1  ;;  %v402_v40 = vmul.f32 %v1496_v44, %v1715_v5  ;;  %v2563_v44 = vld [vmem:[#allocation55_spill] sm:$0xff]  ;;  %v2564_v45 = vld [vmem:[#allocation56_spill] sm:$0xff] }
  0x72   :  { %v333_v26 = vadd.f32 %v332_v11, %v322_v34  ;;  %v410_v59 = vadd.f32 %v409_v14, %v399_v23  ;;  %v403_v17 = vmul.f32 %v2559_v20, %v1720_v38  ;;  %v479_v18 = vmul.f32 %v2560_v53, %v1685_v31  ;;  %v2562_v34 = vld [vmem:[#allocation50_spill] sm:$0xff] }
  0x73   :  { %v257_v16 = vrot.slane %v256_v33, 2  ;;  %v488_v22 = vadd.f32 %v487_v61, %v477_v52  ;;  %v86_v37 = vadd.f32 %v85_v30, %v84_v2  ;;  %v404_v15 = vmul.f32 %v2561_v57, %v1733_v29  ;;  %v2566_v30 = vld [vmem:[#allocation53_spill] sm:$0xff]  ;;  %v2570_v20 = vld [vmem:[#allocation58_spill] sm:$0xff] }
  0x74   :  { %v334_v41 = vadd.f32 %v333_v26, %v323_v13  ;;  %v411_v27 = vadd.f32 %v410_v59, %v400_v3  ;;  %v480_v56 = vmul.f32 %v2562_v34, %v1696_v7  ;;  %v556_v23 = vmul.f32 %v2563_v44, %v1628_v6  ;;  %v2572_v34 = vld [vmem:[#allocation65_spill] sm:$0xff]  ;;  %v2573_v44 = vld [vmem:[#allocation59_spill] sm:$0xff] }
  0x75   :  { %v489_v1 = vadd.f32 %v488_v22, %v478_v8  ;;  %v557_v21 = vmul.f32 %v2564_v45, %v1633_v55  ;;  %v179_v35 = vadd.f32 %v178_v47, %v177_v39  ;;  %v405_v2 = vmul.f32 %v2565_v24, %v1747_v63  ;;  %v2567_v39 = vld [vmem:[#allocation54_spill] sm:$0xff]  ;;  %v2568_v8 = vld [vmem:[#allocation57_spill] sm:$0xff]  ;;  %v2574_v45 = vld [vmem:[#allocation63_spill] sm:$0xff] }
  0x76   :  { %v335_v19 = vadd.f32 %v334_v41, %v324_v43  ;;  %v412_v13 = vadd.f32 %v411_v27, %v401_v12  ;;  %v258_v52 = vadd.f32 %v257_v16, %v256_v33  ;;  %v481_v11 = vmul.f32 %v2566_v30, %v1701_v51  ;;  %v2569_v33 = vld [vmem:[#allocation61_spill] sm:$0xff]  ;;  %v2571_v22 = vld [vmem:[#allocation62_spill] sm:$0xff] }
  0x77   :  { %v490_v25 = vadd.f32 %v489_v1, %v479_v18  ;;  %v558_v3 = vmul.f32 %v1543_v32, %v1650_v9  ;;  %v130_v14 = vsel %vm128_vm0, %v86_v37, 0.0  ;;  %v482_v43 = vmul.f32 %v2567_v39, %v1710_v28 }
  0x78   :  { %v336_v58 = vrot.slane %v335_v19, 4  ;;  %v413_v0 = vadd.f32 %v412_v13, %v402_v40  ;;  %v483_v61 = vmul.f32 %v2568_v8, %v1715_v5  ;;  %v559_v47 = vmul.f32 %v2569_v33, %v1668_v46  ;;  %v2575_v13 = vld [vmem:[#allocation60_spill] sm:$0xff]  ;;  %v2578_v33 = vld [vmem:[#allocation67_spill] sm:$0xff] }
  0x79   :  { %v491_v12 = vadd.f32 %v490_v25, %v480_v56  ;;  %v568_v26 = vadd.f32 %v557_v21, %v556_v23  ;;  %v211_v59 = vsel %vm209_vm1, %v179_v35, 0.0  ;;  %v484_v53 = vmul.f32 %v2570_v20, %v1720_v38 }
  0x7a   :  { %v337_v32 = vadd.f32 %v336_v58, %v335_v19  ;;  %v414_v16 = vadd.f32 %v413_v0, %v403_v17  ;;  %v259_v40 = vrot.slane %v258_v52, 1  ;;  %v560_v37 = vmul.f32 %v2571_v22, %v1685_v31 }
  0x7b   :  { %v492_v18 = vadd.f32 %v491_v12, %v481_v11  ;;  %v569_v41 = vadd.f32 %v568_v26, %v558_v3  ;;  %v637_v56 = vmul.f32 %v2572_v34, %v1628_v6  ;;  %v638_v1 = vmul.f32 %v1580_v49, %v1633_v55  ;;  %v2576_v49 = vld [vmem:[#allocation64_spill] sm:$0xff] }
  0x7c   :  { %v338_v57 = vrot.slane %v337_v32, 2  ;;  %v415_v27 = vadd.f32 %v414_v16, %v404_v15  ;;  %v485_v17 = vmul.f32 %v2573_v44, %v1733_v29  ;;  %v561_v21 = vmul.f32 %v2574_v45, %v1696_v7  ;;  %v1911_v16 = vld [vmem:[#allocation2 + $0x300] sm:$0xff] }
  0x7d   :  { %v493_v23 = vadd.f32 %v492_v18, %v482_v43  ;;  %v570_v35 = vadd.f32 %v569_v41, %v559_v47  ;;  %v213_v19 = vadd.f32 %v211_v59, %v130_v14  ;;  %v486_v30 = vmul.f32 %v2575_v13, %v1747_v63 }
  0x7e   :  { %v416_v24 = vadd.f32 %v415_v27, %v405_v2  ;;  %v639_v15 = vmul.f32 %v1591_v48, %v1650_v9  ;;  %v260_v11 = vadd.f32 %v259_v40, %v258_v52  ;;  %v562_v3 = vmul.f32 %v2576_v49, %v1701_v51  ;;  %v2577_v2 = vld [vmem:[#allocation66_spill] sm:$0xff]  ;;  %v2580_v40 = vld [vmem:[#allocation69_spill] sm:$0xff] }
  0x7f   :  { %v494_v25 = vadd.f32 %v493_v23, %v483_v61  ;;  %v571_v58 = vadd.f32 %v570_v35, %v560_v37  ;;  %v339_v0 = vadd.f32 %v338_v57, %v337_v32  ;;  %v640_v43 = vmul.f32 %v1609_v50, %v1668_v46  ;;  %v2579_v61 = vld [vmem:[#allocation68_spill] sm:$0xff]  ;;  %v1913_v50 = vld [vmem:[#allocation2 + $0x308] sm:$0xff] }
  0x80   :  { %v417_v39 = vrot.slane %v416_v24, 4  ;;  %v649_v8 = vadd.f32 %v638_v1, %v637_v56  ;;  %v563_v12 = vmul.f32 %v2577_v2, %v1710_v28  ;;  %v564_v47 = vmul.f32 %v2578_v33, %v1715_v5  ;;  %v1926_v1 = vld [vmem:[%s2343_s1] sm:$0xff]  ;;  %v2582_v33 = vld [vmem:[#allocation71_spill] sm:$0xff] }
  0x81   :  { %v495_v14 = vadd.f32 %v494_v25, %v484_v53  ;;  %v572_v48 = vadd.f32 %v571_v58, %v561_v21  ;;  %v565_v26 = vmul.f32 %v2579_v61, %v1720_v38  ;;  %v641_v59 = vmul.f32 %v1613_v60, %v1685_v31  ;;  %v1921_v60 = vld [vmem:[#allocation2 + $0x310] sm:$0xff]  ;;  %v1954_v58 = vld [vmem:[#allocation2 + $0x320] sm:$0xff] }
  0x82   :  { %v418_v52 = vadd.f32 %v417_v39, %v416_v24  ;;  %v650_v32 = vadd.f32 %v649_v8, %v639_v15  ;;  %v292_v20 = vsel %vm290_vm2, %v260_v11, 0.0  ;;  %v566_v18 = vmul.f32 %v2580_v40, %v1733_v29  ;;  %v1941_v24 = vld [vmem:[#allocation2 + $0x318] sm:$0xff]  ;;  %v1946_v11 = vld [vmem:[%s2343_s1 + $0x10] sm:$0xff] }
  0x83   :  { %v496_v53 = vadd.f32 %v495_v14, %v485_v17  ;;  %v573_v22 = vadd.f32 %v572_v48, %v562_v3  ;;  %v340_v37 = vrot.slane %v339_v0, 1  ;;  %v642_v57 = vmul.f32 %v1637_v10, %v1696_v7  ;;  %v1933_v17 = vld [vmem:[%s2343_s1 + $0x8] sm:$0xff]  ;;  %v1961_v8 = vld [vmem:[%s2343_s1 + $0x18] sm:$0xff] }
  0x84   :  { %v419_v41 = vrot.slane %v418_v52, 2  ;;  %v651_v27 = vadd.f32 %v650_v32, %v640_v43  ;;  %v747_v44 = vmul.f32 %v1926_v1, %v1911_v16  ;;  %v748_v10 = vmul.f32 %v1933_v17, %v1913_v50  ;;  %v1956_v43 = vld [vmem:[#allocation2 + $0x328] sm:$0xff]  ;;  %v1978_v32 = vld [vmem:[%s2343_s1 + $0x20] sm:$0xff] }
  0x85   :  { %v497_v34 = vadd.f32 %v496_v53, %v486_v30  ;;  %v574_v56 = vadd.f32 %v573_v22, %v563_v12  ;;  %v567_v45 = vmul.f32 %v1611_v36, %v1747_v63  ;;  %v643_v21 = vmul.f32 %v1639_v4, %v1701_v51 }
  0x86   :  { %v420_v23 = vadd.f32 %v419_v41, %v418_v52  ;;  %v652_v35 = vadd.f32 %v651_v27, %v641_v59  ;;  %v294_v13 = vadd.f32 %v292_v20, %v213_v19  ;;  %v749_v25 = vmul.f32 %v1946_v11, %v1921_v60  ;;  %v1971_v52 = vld [vmem:[#allocation2 + $0x368] sm:$0xff]  ;;  %v1973_v59 = vld [vmem:[#allocation2 + $0x330] sm:$0xff] }
  0x87   :  { %v498_v30 = vrot.slane %v497_v34, 4  ;;  %v575_v15 = vadd.f32 %v574_v56, %v564_v47  ;;  %v341_v49 = vadd.f32 %v340_v37, %v339_v0  ;;  %v644_v36 = vmul.f32 %v1645_v62, %v1710_v28  ;;  %v1965_v62 = vld [vmem:[#allocation2 + $0x360] sm:$0xff]  ;;  %v1987_v37 = vld [vmem:[%s2343_s1 + $0x28] sm:$0xff]  ;;  %v1991_v41 = vld [vmem:[#allocation2 + $0x370] sm:$0xff] }
  0x88   :  { %v645_v4 = vmul.f32 %v1652_v54, %v1715_v5  ;;  %v653_v3 = vadd.f32 %v652_v35, %v642_v57  ;;  %v750_v0 = vmul.f32 %v1961_v8, %v1941_v24  ;;  %v759_v14 = vadd.f32 %v748_v10, %v747_v44  ;;  %v2581_v54 = vld [vmem:[#allocation70_spill] sm:$0xff]  ;;  %v1995_v56 = vld [vmem:[#allocation2 + $0x338] sm:$0xff]  ;;  %v1997_v44 = vld [vmem:[#allocation2 + $0x340] sm:$0xff] }
  0x89   :  { %v499_v19 = vadd.f32 %v498_v30, %v497_v34  ;;  %v576_v39 = vadd.f32 %v575_v15, %v565_v26  ;;  %v421_v2 = vrot.slane %v420_v23, 1  ;;  %v646_v12 = vmul.f32 %v2581_v54, %v1720_v38  ;;  %2583 = vst [vmem:[#allocation5_spill] sm:$0xff] %v1995_v56  ;;  %2584 = vst [vmem:[#allocation6_spill] sm:$0xff] %v1997_v44  ;;  %v2585_v30 = vld [vmem:[#allocation72_spill] sm:$0xff]  ;;  %v2080_v38 = vld [vmem:[#allocation2 + $0x3a0] sm:$0xff] }
  0x8a   :  { %v647_v47 = vmul.f32 %v2582_v33, %v1733_v29  ;;  %v654_v48 = vadd.f32 %v653_v3, %v643_v21  ;;  %v751_v20 = vmul.f32 %v1978_v32, %v1954_v58  ;;  %v760_v53 = vadd.f32 %v759_v14, %v749_v25  ;;  %v2026_v33 = vld [vmem:[%s2343_s1 + $0x40] sm:$0xff]  ;;  %v2064_v29 = vld [vmem:[#allocation2 + $0x3d0] sm:$0xff]  ;;  %v2107_v5 = vld [vmem:[#allocation2 + $0x428] sm:$0xff] }
  0x8b   :  { %v500_v61 = vrot.slane %v499_v19, 2  ;;  %v577_v26 = vadd.f32 %v576_v39, %v566_v18  ;;  %v373_v40 = vsel %vm371_vm3, %v341_v49, 0.0  ;;  %v752_v18 = vmul.f32 %v1987_v37, %v1956_v43  ;;  %v2006_v49 = vld [vmem:[%s2343_s1 + $0x30] sm:$0xff]  ;;  %v2012_v39 = vld [vmem:[#allocation2 + $0x348] sm:$0xff]  ;;  %2594 = vst [vmem:[#allocation16_spill] sm:$0xff] %v2064_v29  ;;  %2598 = vst [vmem:[#allocation18_spill] sm:$0xff] %v2107_v5 }
  0x8c   :  { %v655_v22 = vadd.f32 %v654_v48, %v644_v36  ;;  %v828_v57 = vmul.f32 %v1926_v1, %v1965_v62  ;;  %v761_v10 = vadd.f32 %v760_v53, %v750_v0  ;;  %v829_v21 = vmul.f32 %v1933_v17, %v1971_v52  ;;  %v2010_v36 = vld [vmem:[#allocation2 + $0x378] sm:$0xff]  ;;  %2587 = vst [vmem:[#allocation7_spill] sm:$0xff] %v2012_v39 }
  0x8d   :  { %v501_v27 = vadd.f32 %v500_v61, %v499_v19  ;;  %v578_v34 = vadd.f32 %v577_v26, %v567_v45  ;;  %v422_v35 = vadd.f32 %v421_v2, %v420_v23  ;;  %v648_v15 = vmul.f32 %v2585_v30, %v1747_v63  ;;  %2586 = vst [vmem:[#allocation8_spill] sm:$0xff] %v2010_v36  ;;  %v2019_v2 = vld [vmem:[%s2343_s1 + $0x38] sm:$0xff]  ;;  %v2030_v61 = vld [vmem:[#allocation2 + $0x380] sm:$0xff] }
  0x8e   :  { %v656_v25 = vadd.f32 %v655_v22, %v645_v4  ;;  %v753_v45 = vmul.f32 %v2006_v49, %v1973_v59  ;;  %v762_v0 = vadd.f32 %v761_v10, %v751_v20  ;;  %v830_v23 = vmul.f32 %v1946_v11, %v1991_v41  ;;  %2588 = vst [vmem:[#allocation9_spill] sm:$0xff] %v2030_v61  ;;  %v2034_v20 = vld [vmem:[#allocation2 + $0x388] sm:$0xff]  ;;  %v2038_v22 = vld [vmem:[#allocation2 + $0x3c0] sm:$0xff] }
  0x8f   :  { %v502_v3 = vrot.slane %v501_v27, 1  ;;  %v579_v19 = vrot.slane %v578_v34, 4  ;;  %v375_v14 = vadd.f32 %v373_v40, %v294_v13  ;;  %v754_v54 = vmul.f32 %v2019_v2, %v1995_v56  ;;  %2590 = vst [vmem:[#allocation12_spill] sm:$0xff] %v2034_v20  ;;  %2591 = vst [vmem:[#allocation13_spill] sm:$0xff] %v2038_v22 }
  0x90   :  { %v657_v4 = vadd.f32 %v656_v25, %v646_v12  ;;  %v755_v48 = vmul.f32 %v2026_v33, %v1997_v44  ;;  %v2032_v12 = vld [vmem:[#allocation2 + $0x350] sm:$0xff]  ;;  %v763_v26 = vadd.f32 %v762_v0, %v752_v18  ;;  %v831_v53 = vmul.f32 %v1961_v8, %v2010_v36 }
  0x91   :  { %v580_v13 = vadd.f32 %v579_v19, %v578_v34  ;;  %2589 = vst [vmem:[#allocation10_spill] sm:$0xff] %v2032_v12  ;;  %v840_v40 = vadd.f32 %v829_v21, %v828_v57  ;;  %v454_v10 = vsel %vm452_vm4, %v422_v35, 0.0  ;;  %v503_v30 = vadd.f32 %v502_v3, %v501_v27  ;;  %v2045_v34 = vld [vmem:[%s2343_s1 + $0x48] sm:$0xff]  ;;  %v2051_v57 = vld [vmem:[#allocation2 + $0x390] sm:$0xff] }
  0x92   :  { %v658_v25 = vadd.f32 %v657_v4, %v647_v47  ;;  %v756_v18 = vmul.f32 %v2045_v34, %v2012_v39  ;;  %v2049_v19 = vld [vmem:[#allocation2 + $0x3c8] sm:$0xff]  ;;  %v764_v63 = vadd.f32 %v763_v26, %v753_v45  ;;  %2593 = vst [vmem:[#allocation14_spill] sm:$0xff] %v2051_v57  ;;  %v832_v21 = vmul.f32 %v1978_v32, %v2030_v61  ;;  %v2058_v47 = vld [vmem:[%s2343_s1 + $0x50] sm:$0xff]  ;;  %v2068_v61 = vld [vmem:[#allocation2 + $0x358] sm:$0xff] }
  0x93   :  { %2592 = vst [vmem:[#allocation11_spill] sm:$0xff] %v2049_v19  ;;  %v581_v0 = vrot.slane %v580_v13, 2  ;;  %v841_v35 = vadd.f32 %v840_v40, %v830_v23  ;;  %v757_v3 = vmul.f32 %v2058_v47, %v2032_v12  ;;  %v833_v4 = vmul.f32 %v1987_v37, %v2034_v20  ;;  %2595 = vst [vmem:[#allocation15_spill] sm:$0xff] %v2068_v61  ;;  %v2070_v23 = vld [vmem:[#allocation2 + $0x398] sm:$0xff] }
  0x94   :  { %v659_v27 = vadd.f32 %v658_v25, %v648_v15  ;;  %v909_v45 = vmul.f32 %v1926_v1, %v2038_v22  ;;  %v765_v15 = vadd.f32 %v764_v63, %v754_v54  ;;  %2596 = vst [vmem:[#allocation17_spill] sm:$0xff] %v2070_v23  ;;  %v2072_v25 = vld [vmem:[#allocation2 + $0x3d8] sm:$0xff]  ;;  %v910_v12 = vmul.f32 %v1933_v17, %v2049_v19  ;;  %v2082_v63 = vld [vmem:[#allocation2 + $0x3a8] sm:$0xff] }
  0x95   :  { %v582_v26 = vadd.f32 %v581_v0, %v580_v13  ;;  %v842_v40 = vadd.f32 %v841_v35, %v831_v53  ;;  %2597 = vst [vmem:[#allocation19_spill] sm:$0xff] %v2072_v25  ;;  %v456_v36 = vadd.f32 %v454_v10, %v375_v14  ;;  %v535_v20 = vsel %vm533_vm5, %v503_v30, 0.0  ;;  %v2089_v14 = vld [vmem:[%s2343_s1 + $0x58] sm:$0xff]  ;;  %v2095_v30 = vld [vmem:[#allocation2 + $0x3e0] sm:$0xff] }
  0x96   :  { %v660_v39 = vrot.slane %v659_v27, 4  ;;  %v834_v22 = vmul.f32 %v2006_v49, %v2051_v57  ;;  %v766_v0 = vadd.f32 %v765_v15, %v755_v48  ;;  %v911_v53 = vmul.f32 %v1946_v11, %v2064_v29  ;;  %v2101_v29 = vld [vmem:[#allocation2 + $0x420] sm:$0xff] }
  0x97   :  { %v583_v13 = vrot.slane %v582_v26, 1  ;;  %v843_v54 = vadd.f32 %v842_v40, %v832_v21  ;;  %v758_v10 = vmul.f32 %v2089_v14, %v2068_v61  ;;  %v835_v48 = vmul.f32 %v2019_v2, %v2070_v23 }
  0x98   :  { %v661_v35 = vadd.f32 %v660_v39, %v659_v27  ;;  %v912_v21 = vmul.f32 %v1961_v8, %v2072_v25  ;;  %v767_v40 = vadd.f32 %v766_v0, %v756_v18  ;;  %v2099_v39 = vld [vmem:[#allocation2 + $0x3e8] sm:$0xff]  ;;  %v921_v27 = vadd.f32 %v910_v12, %v909_v45  ;;  %v2109_v25 = vld [vmem:[#allocation2 + $0x3b0] sm:$0xff]  ;;  %v2121_v0 = vld [vmem:[#allocation2 + $0x3b8] sm:$0xff] }
  0x99   :  { %v584_v15 = vadd.f32 %v583_v13, %v582_v26  ;;  %v844_v57 = vadd.f32 %v843_v54, %v833_v4  ;;  %v537_v19 = vadd.f32 %v535_v20, %v456_v36  ;;  %v836_v61 = vmul.f32 %v2026_v33, %v2080_v38  ;;  %2599 = vst [vmem:[#allocation23_spill] sm:$0xff] %v2109_v25  ;;  %v2111_v4 = vld [vmem:[#allocation2 + $0x3f0] sm:$0xff] }
  0x9a   :  { %v662_v44 = vrot.slane %v661_v35, 2  ;;  %v837_v23 = vmul.f32 %v2045_v34, %v2082_v63  ;;  %v768_v56 = vadd.f32 %v767_v40, %v757_v3  ;;  %2600 = vst [vmem:[#allocation20_spill] sm:$0xff] %v2111_v4  ;;  %v913_v12 = vmul.f32 %v1978_v32, %v2095_v30  ;;  %2601 = vst [vmem:[#allocation21_spill] sm:$0xff] %v2121_v0  ;;  %v2125_v40 = vld [vmem:[#allocation2 + $0x430] sm:$0xff] }
  0x9b   :  { %v845_v18 = vadd.f32 %v844_v57, %v834_v22  ;;  %v922_v45 = vadd.f32 %v921_v27, %v911_v53  ;;  %v616_v36 = vsel %vm614_vm6, %v584_v15, 0.0  ;;  %v914_v26 = vmul.f32 %v1987_v37, %v2099_v39  ;;  %v2123_v57 = vld [vmem:[#allocation2 + $0x3f8] sm:$0xff] }
  0x9c   :  { %v663_v20 = vadd.f32 %v662_v44, %v661_v35  ;;  %v990_v13 = vmul.f32 %v1926_v1, %v2101_v29  ;;  %v769_v3 = vadd.f32 %v768_v56, %v758_v10  ;;  %v991_v53 = vmul.f32 %v1933_v17, %v2107_v5 }
  0x9d   :  { %v846_v22 = vadd.f32 %v845_v18, %v835_v48  ;;  %v923_v54 = vadd.f32 %v922_v45, %v912_v21  ;;  %v838_v44 = vmul.f32 %v2058_v47, %v2109_v25  ;;  %v915_v35 = vmul.f32 %v2006_v49, %v2111_v4  ;;  %v2133_v48 = vld [vmem:[#allocation2 + $0x438] sm:$0xff]  ;;  %v2137_v45 = vld [vmem:[#allocation2 + $0x400] sm:$0xff] }
  0x9e   :  { %v664_v15 = vrot.slane %v663_v20, 1  ;;  %v618_v1 = vadd.f32 %v616_v36, %v537_v19  ;;  %v770_v56 = vrot.slane %v769_v3, 4  ;;  %v839_v21 = vmul.f32 %v2089_v14, %v2121_v0  ;;  %v2143_v36 = vld [vmem:[#allocation2 + $0x440] sm:$0xff] }
  0x9f   :  { %v847_v10 = vadd.f32 %v846_v22, %v836_v61  ;;  %v924_v27 = vadd.f32 %v923_v54, %v913_v12  ;;  %v916_v17 = vmul.f32 %v2019_v2, %v2123_v57  ;;  %v992_v25 = vmul.f32 %v1946_v11, %v2125_v40  ;;  %v2150_v22 = vld [vmem:[#allocation2 + $0x408] sm:$0xff]  ;;  %v2154_v11 = vld [vmem:[#allocation2 + $0x410] sm:$0xff] }
  0xa0   :  { %v665_v18 = vadd.f32 %v664_v15, %v663_v20  ;;  %v771_v5 = vadd.f32 %v770_v56, %v769_v3  ;;  %v1002_v61 = vadd.f32 %v991_v53, %v990_v13  ;;  %v2148_v20 = vadd.s32 8, %v1306_v42  ;;  %2602 = vst [vmem:[#allocation25_spill] sm:$0xff] %v2154_v11  ;;  %v2158_v13 = vld [vmem:[#allocation2 + $0x448] sm:$0xff]  ;;  %v2160_v3 = vld [vmem:[#allocation2 + $0x418] sm:$0xff]  ;;  %v2162_v53 = vld [vmem:[#allocation2 + $0x450] sm:$0xff] }
  0xa1   :  { %v848_v4 = vadd.f32 %v847_v10, %v837_v23  ;;  %v925_v19 = vadd.f32 %v924_v27, %v914_v26  ;;  %v993_v54 = vmul.f32 %v1961_v8, %v2133_v48  ;;  %v917_v23 = vmul.f32 %v2026_v33, %v2137_v45  ;;  %2603 = vst [vmem:[#allocation24_spill] sm:$0xff] %v2160_v3  ;;  %v2172_v27 = vld [vmem:[#allocation2 + $0x458] sm:$0xff] }
  0xa2   :  { %v697_v12 = vsel %vm695_vm7, %v665_v18, 0.0  ;;  %v994_v42 = vmul.f32 %v1978_v32, %v2143_v36  ;;  %v1003_v56 = vadd.f32 %v1002_v61, %v992_v25  ;;  %v718_v8 = vmul.f32 %v1911_v16, %v1628_v6  ;;  %v2176_v32 = vld [vmem:[#allocation2 + $0x460] sm:$0xff] }
  0xa3   :  { %v699_v15 = vadd.f32 %v697_v12, %v618_v1  ;;  %v849_v0 = vadd.f32 %v848_v4, %v838_v44  ;;  %v926_v26 = vadd.f32 %v925_v19, %v915_v35  ;;  %v719_v4 = vmul.f32 %v1913_v50, %v1633_v55  ;;  %v2188_v12 = vld [vmem:[#allocation2 + $0x470] sm:$0xff] }
  0xa4   :  { %v772_v44 = vrot.slane %v771_v5, 2  ;;  %v918_v35 = vmul.f32 %v2045_v34, %v2150_v22  ;;  %v919_v18 = vmul.f32 %v2058_v47, %v2154_v11  ;;  %v995_v16 = vmul.f32 %v1987_v37, %v2158_v13 }
  0xa5   :  { %1031 = vadd.xlane.f32.xlu0 %v699_v15  ;;  %v850_v1 = vadd.f32 %v849_v0, %v839_v21  ;;  %v927_v10 = vadd.f32 %v926_v26, %v916_v17  ;;  %v1004_v25 = vadd.f32 %v1003_v56, %v993_v54  ;;  %v720_v50 = vmul.f32 %v1921_v60, %v1650_v9  ;;  %v2184_v17 = vld [vmem:[#allocation2 + $0x468] sm:$0xff] }
  0xa6   :  { %v920_v0 = vmul.f32 %v2089_v14, %v2160_v3  ;;  %v996_v61 = vmul.f32 %v2006_v49, %v2162_v53  ;;  %v997_v15 = vmul.f32 %v2019_v2, %v2172_v27  ;;  %v721_v54 = vmul.f32 %v1941_v24, %v1668_v46 }
  0xa7   :  { %v851_v19 = vrot.slane %v850_v1, 4  ;;  %v928_v21 = vadd.f32 %v927_v10, %v917_v23  ;;  %v1005_v37 = vadd.f32 %v1004_v25, %v994_v42  ;;  %v730_v60 = vadd.f32 %v719_v4, %v718_v8  ;;  %v2197_v10 = vld [vmem:[#allocation2 + $0x478] sm:$0xff]  ;;  %v2607_v25 = vld [vmem:[#allocation6_spill] sm:$0xff] }
  0xa8   :  { %v773_v26 = vadd.f32 %v772_v44, %v771_v5  ;;  %v998_v23 = vmul.f32 %v2026_v33, %v2176_v32  ;;  %vm777_vm8 = vcmp.eq.s32.totalorder %v2148_v20, 8  ;;  %2604 = vst [vmem:[#allocation22_spill] sm:$0xff] %v2197_v10  ;;  %v999_v49 = vmul.f32 %v2045_v34, %v2184_v17 }
  0xa9   :  { %v852_v56 = vadd.f32 %v851_v19, %v850_v1  ;;  %v929_v11 = vadd.f32 %v928_v21, %v918_v35  ;;  %v1006_v3 = vadd.f32 %v1005_v37, %v995_v16  ;;  %v722_v2 = vmul.f32 %v1954_v58, %v1685_v31  ;;  %v2608_v19 = vld [vmem:[#allocation74_spill] sm:$0xff] }
  0xaa   :  { %v731_v42 = vadd.f32 %v730_v60, %v720_v50  ;;  %v1000_v5 = vmul.f32 %v2058_v47, %v2188_v12  ;;  %v723_v33 = vmul.f32 %v1956_v43, %v1696_v7  ;;  %v799_v1 = vmul.f32 %v1965_v62, %v1628_v6  ;;  %v2605_v62 = vld [vmem:[#allocation5_spill] sm:$0xff] }
  0xab   :  { %v853_v24 = vrot.slane %v852_v56, 2  ;;  %v930_v8 = vadd.f32 %v929_v11, %v919_v18  ;;  %v1007_v4 = vadd.f32 %v1006_v3, %v996_v61  ;;  %v800_v34 = vmul.f32 %v1971_v52, %v1633_v55  ;;  %v2606_v52 = vld [vmem:[#allocation73_spill] sm:$0xff] }
  0xac   :  { %v732_v44 = vadd.f32 %v731_v42, %v721_v54  ;;  %v774_v35 = vrot.slane %v773_v26, 1  ;;  %v1001_v11 = vmul.f32 %v2089_v14, %v2197_v10  ;;  %vm858_vm9 = vcmp.eq.s32.totalorder %v2148_v20, 9 }
  0xad   :  { %v854_v16 = vadd.f32 %v853_v24, %v852_v56  ;;  %v931_v58 = vadd.f32 %v930_v8, %v920_v0  ;;  %v1008_v47 = vadd.f32 %v1007_v4, %v997_v15  ;;  %v724_v43 = vmul.f32 %v1973_v59, %v1701_v51  ;;  %v2609_v0 = vld [vmem:[#allocation7_spill] sm:$0xff]  ;;  %v2610_v15 = vld [vmem:[#allocation8_spill] sm:$0xff]  ;;  %v2613_v4 = vld [vmem:[#allocation9_spill] sm:$0xff] }
  0xae   :  { %v733_v3 = vadd.f32 %v732_v44, %v722_v2  ;;  %v801_v18 = vmul.f32 %v1991_v41, %v1650_v9  ;;  %v725_v55 = vmul.f32 %v2605_v62, %v1710_v28  ;;  %v726_v50 = vmul.f32 %v2607_v25, %v2606_v52  ;;  %v2611_v41 = vld [vmem:[#allocation75_spill] sm:$0xff]  ;;  %v2612_v2 = vld [vmem:[#allocation10_spill] sm:$0xff] }
  0xaf   :  { %v932_v6 = vrot.slane %v931_v58, 4  ;;  %v727_v14 = vmul.f32 %v2609_v0, %v2608_v19  ;;  %v1009_v21 = vadd.f32 %v1008_v47, %v998_v23  ;;  %v802_v37 = vmul.f32 %v2610_v15, %v1668_v46  ;;  %v2614_v23 = vld [vmem:[#allocation76_spill] sm:$0xff] }
  0xb0   :  { %v734_v61 = vadd.f32 %v733_v3, %v723_v33  ;;  %v811_v59 = vadd.f32 %v800_v34, %v799_v1  ;;  %v775_v54 = vadd.f32 %v774_v35, %v773_v26  ;;  %v855_v60 = vrot.slane %v854_v16, 1  ;;  %v2615_v33 = vld [vmem:[#allocation15_spill] sm:$0xff]  ;;  %v1128_v26 = vld [vmem:[%s2342_s0] sm:$0xff] }
  0xb1   :  { %v933_v56 = vadd.f32 %v932_v6, %v931_v58  ;;  %v728_v42 = vmul.f32 %v2612_v2, %v2611_v41  ;;  %v1010_v24 = vadd.f32 %v1009_v21, %v999_v49  ;;  %v803_v44 = vmul.f32 %v2613_v4, %v1685_v31  ;;  %v2616_v1 = vld [vmem:[#allocation13_spill] sm:$0xff]  ;;  %v1129_v49 = vld [vmem:[%s2342_s0 + $0x8] sm:$0xff]  ;;  %v2617_v35 = vld [vmem:[#allocation11_spill] sm:$0xff] }
  0xb2   :  { %v735_v8 = vadd.f32 %v734_v61, %v724_v43  ;;  %v812_v62 = vadd.f32 %v811_v59, %v801_v18  ;;  %vm939_vm10 = vcmp.eq.s32.totalorder %v2148_v20, 10  ;;  %v729_v47 = vmul.f32 %v2615_v33, %v2614_v23  ;;  %v2618_v18 = vld [vmem:[#allocation12_spill] sm:$0xff] }
  0xb3   :  { %v934_v25 = vrot.slane %v933_v56, 2  ;;  %v880_v34 = vmul.f32 %v1128_v26, %v2616_v1  ;;  %v881_v58 = vmul.f32 %v1129_v49, %v2617_v35  ;;  %v1011_v43 = vadd.f32 %v1010_v24, %v1000_v5  ;;  %v2619_v59 = vld [vmem:[#allocation16_spill] sm:$0xff]  ;;  %v2620_v1 = vld [vmem:[#allocation14_spill] sm:$0xff] }
  0xb4   :  { %v736_v3 = vadd.f32 %v735_v8, %v725_v55  ;;  %v804_v6 = vmul.f32 %v2618_v18, %v1696_v7  ;;  %v813_v0 = vadd.f32 %v812_v62, %v802_v37  ;;  %v783_v21 = vsel %vm777_vm8, %v775_v54, 0.0  ;;  %v2621_v55 = vld [vmem:[#allocation17_spill] sm:$0xff]  ;;  %v2622_v37 = vld [vmem:[#allocation19_spill] sm:$0xff] }
  0xb5   :  { %v856_v61 = vadd.f32 %v855_v60, %v854_v16  ;;  %v935_v15 = vadd.f32 %v934_v25, %v933_v56  ;;  %v882_v2 = vmul.f32 %v2619_v59, %v1650_v9  ;;  %v1012_v4 = vadd.f32 %v1011_v43, %v1001_v11  ;;  %v2623_v43 = vld [vmem:[#allocation18_spill] sm:$0xff] }
  0xb6   :  { %v737_v33 = vadd.f32 %v736_v3, %v726_v50  ;;  %v805_v10 = vmul.f32 %v2620_v1, %v1701_v51  ;;  %v814_v35 = vadd.f32 %v813_v0, %v803_v44  ;;  %v806_v24 = vmul.f32 %v2621_v55, %v1710_v28 }
  0xb7   :  { %v936_v5 = vrot.slane %v935_v15, 1  ;;  %v883_v8 = vmul.f32 %v2622_v37, %v1668_v46  ;;  %v892_v62 = vadd.f32 %v881_v58, %v880_v34  ;;  %v1013_v54 = vrot.slane %v1012_v4, 4 }
  0xb8   :  { %v738_v16 = vadd.f32 %v737_v33, %v727_v14  ;;  %v807_v60 = vmul.f32 %v2080_v38, %v2606_v52  ;;  %v815_v9 = vadd.f32 %v814_v35, %v804_v6  ;;  %v864_v11 = vsel %vm858_vm9, %v856_v61, 0.0  ;;  %v1132_v33 = vld [vmem:[%s2342_s0 + $0x40] sm:$0xff] }
  0xb9   :  { %vm1020_vm11 = vcmp.eq.s32.totalorder %v2148_v20, 11  ;;  %v808_v50 = vmul.f32 %v2082_v63, %v2608_v19  ;;  %v884_v56 = vmul.f32 %v2095_v30, %v1685_v31  ;;  %v893_v44 = vadd.f32 %v892_v62, %v882_v2  ;;  %v2624_v63 = vld [vmem:[#allocation23_spill] sm:$0xff]  ;;  %v2625_v30 = vld [vmem:[#allocation20_spill] sm:$0xff]  ;;  %v1133_v35 = vld [vmem:[%s2342_s0 + $0x20] sm:$0xff] }
  0xba   :  { %v937_v46 = vadd.f32 %v936_v5, %v935_v15  ;;  %v1014_v25 = vadd.f32 %v1013_v54, %v1012_v4  ;;  %v739_v34 = vadd.f32 %v738_v16, %v728_v42  ;;  %v816_v14 = vadd.f32 %v815_v9, %v805_v10  ;;  %v1136_v9 = vld [vmem:[%s2342_s0 + $0x50] sm:$0xff] }
  0xbb   :  { %v885_v38 = vmul.f32 %v2099_v39, %v1696_v7  ;;  %v894_v52 = vadd.f32 %v893_v44, %v883_v8  ;;  %v961_v58 = vmul.f32 %v1128_v26, %v2101_v29  ;;  %v962_v3 = vmul.f32 %v1129_v49, %v2623_v43  ;;  %v1130_v7 = vld [vmem:[%s2342_s0 + $0x10] sm:$0xff]  ;;  %v1139_v43 = vld [vmem:[%s2342_s0 + $0x38] sm:$0xff] }
  0xbc   :  { %v1015_v18 = vrot.slane %v1014_v25, 2  ;;  %v740_v6 = vadd.f32 %v739_v34, %v729_v47  ;;  %v809_v19 = vmul.f32 %v2624_v63, %v2611_v41  ;;  %v817_v0 = vadd.f32 %v816_v14, %v806_v24  ;;  %v1137_v44 = vld [vmem:[%s2342_s0 + $0x30] sm:$0xff]  ;;  %v1138_v34 = vld [vmem:[%s2342_s0 + $0x58] sm:$0xff] }
  0xbd   :  { %v866_v31 = vadd.f32 %v864_v11, %v783_v21  ;;  %v886_v61 = vmul.f32 %v2625_v30, %v1701_v51  ;;  %v895_v42 = vadd.f32 %v894_v52, %v884_v56  ;;  %v963_v39 = vmul.f32 %v1130_v7, %v2125_v40  ;;  %v1131_v51 = vld [vmem:[%s2342_s0 + $0x18] sm:$0xff]  ;;  %v2626_v40 = vld [vmem:[#allocation21_spill] sm:$0xff] }
  0xbe   :  { %v945_v29 = vsel %vm939_vm10, %v937_v46, 0.0  ;;  %v1016_v10 = vadd.f32 %v1015_v18, %v1014_v25  ;;  %v818_v47 = vadd.f32 %v817_v0, %v807_v60  ;;  %v887_v41 = vmul.f32 %v2123_v57, %v1710_v28  ;;  %v2627_v11 = vld [vmem:[#allocation25_spill] sm:$0xff]  ;;  %v2628_v14 = vld [vmem:[#allocation24_spill] sm:$0xff] }
  0xbf   :  { %v741_v26 = vrot.slane %v740_v6, 4  ;;  %v896_v49 = vadd.f32 %v895_v42, %v885_v38  ;;  %v964_v21 = vmul.f32 %v1131_v51, %v2133_v48  ;;  %v973_v15 = vadd.f32 %v962_v3, %v961_v58 }
  0xc0   :  { %v1017_v59 = vrot.slane %v1016_v10, 1  ;;  %v810_v2 = vmul.f32 %v2626_v40, %v2614_v23  ;;  %v819_v4 = vadd.f32 %v818_v47, %v808_v50  ;;  %v888_v28 = vmul.f32 %v1132_v33, %v2137_v45  ;;  %v1134_v23 = vld [vmem:[%s2342_s0 + $0x48] sm:$0xff] }
  0xc1   :  { %v947_v57 = vadd.f32 %v945_v29, %v866_v31  ;;  %v897_v1 = vadd.f32 %v896_v49, %v886_v61  ;;  %v965_v48 = vmul.f32 %v1133_v35, %v2143_v36  ;;  %v974_v5 = vadd.f32 %v973_v15, %v963_v39  ;;  %v1135_v45 = vld [vmem:[%s2342_s0 + $0x28] sm:$0xff] }
  0xc2   :  { %v1018_v55 = vadd.f32 %v1017_v59, %v1016_v10  ;;  %v820_v24 = vadd.f32 %v819_v4, %v809_v19  ;;  %v889_v37 = vmul.f32 %v1134_v23, %v2150_v22  ;;  %v742_v8 = vadd.f32 %v741_v26, %v740_v6  ;;  %v2629_v47 = vld [vmem:[#allocation22_spill] sm:$0xff] }
  0xc3   :  { %v898_v62 = vadd.f32 %v897_v1, %v887_v41  ;;  %v966_v54 = vmul.f32 %v1135_v45, %v2158_v13  ;;  %v975_v16 = vadd.f32 %v974_v5, %v964_v21  ;;  %v890_v50 = vmul.f32 %v1136_v9, %v2627_v11 }
  0xc4   :  { %v1026_v36 = vsel %vm1020_vm11, %v1018_v55, 0.0  ;;  %v821_v60 = vadd.f32 %v820_v24, %v810_v2  ;;  %v967_v46 = vmul.f32 %v1137_v44, %v2162_v53  ;;  %v891_v38 = vmul.f32 %v1138_v34, %v2628_v14 }
  0xc5   :  { %v1028_v22 = vadd.f32 %v1026_v36, %v947_v57  ;;  %v899_v56 = vadd.f32 %v898_v62, %v888_v28  ;;  %v976_v13 = vadd.f32 %v975_v16, %v965_v48  ;;  %v743_v52 = vrot.slane %v742_v8, 2 }
  0xc6   :  { %v822_v25 = vrot.slane %v821_v60, 4  ;;  %v968_v3 = vmul.f32 %v1139_v43, %v2172_v27  ;;  %v969_v63 = vmul.f32 %v1132_v33, %v2176_v32  ;;  %v970_v61 = vmul.f32 %v1134_v23, %v2184_v17 }
  0xc7   :  { %1039 = vadd.xlane.f32.xlu1 %v1028_v22  ;;  %v900_v58 = vadd.f32 %v899_v56, %v889_v37  ;;  %v977_v18 = vadd.f32 %v976_v13, %v966_v54  ;;  %v744_v31 = vadd.f32 %v743_v52, %v742_v8  ;;  %v971_v29 = vmul.f32 %v1136_v9, %v2188_v12  ;;  %v1029_v54 = vld [vmem:[%s2345_s3] sm:$0xff] }
  0xc8   :  { %v823_v6 = vadd.f32 %v822_v25, %v821_v60  ;;  %v972_v41 = vmul.f32 %v1138_v34, %v2629_v47  ;;  %v1165_v62 = vmov 0  }
  0xc9   :  { %v901_v53 = vadd.f32 %v900_v58, %v890_v50  ;;  %v978_v19 = vadd.f32 %v977_v18, %v967_v46  ;;  %v745_v27 = vrot.slane %v744_v31, 1  ;;  %1098 = vset.pattern.permute.xlu0 %v1165_v62  ;;  %1099 = vset.pattern.permute.xlu1 %v1165_v62 }
  0xca   :  { %v824_v0 = vrot.slane %v823_v6, 2 }
  0xcb   :  { %v902_v30 = vadd.f32 %v901_v53, %v891_v38  ;;  %v979_v42 = vadd.f32 %v978_v19, %v968_v3  ;;  %v746_v15 = vadd.f32 %v745_v27, %v744_v31  ;;  %v1030_v38 = vld [vmem:[%s2345_s3 + $0x8] sm:$0xff] }
  0xcc   :  { %v825_v7 = vadd.f32 %v824_v0, %v823_v6 }
  0xcd   :  { %v903_v39 = vrot.slane %v902_v30, 4  ;;  %v980_v10 = vadd.f32 %v979_v42, %v969_v63  ;;  %v779_v33 = vsel %vm777_vm8, %v746_v15, 0.0 }
  0xce   :  { %v826_v26 = vrot.slane %v825_v7, 1 }
  0xcf   :  { %v904_v49 = vadd.f32 %v903_v39, %v902_v30  ;;  %v981_v51 = vadd.f32 %v980_v10, %v970_v61 }
  0xd0   :  { %v827_v59 = vadd.f32 %v826_v26, %v825_v7 }
  0xd1   :  { %v905_v21 = vrot.slane %v904_v49, 2  ;;  %v982_v32 = vadd.f32 %v981_v51, %v971_v29 }
  0xd2   :  { %v860_v12 = vsel %vm858_vm9, %v827_v59, 0.0 }
  0xd3   :  { %v906_v40 = vadd.f32 %v905_v21, %v904_v49  ;;  %v983_v2 = vadd.f32 %v982_v32, %v972_v41  ;;  %v862_v35 = vadd.f32 %v860_v12, %v779_v33 }
  0xd5   :  { %v907_v4 = vrot.slane %v906_v40, 1  ;;  %v984_v17 = vrot.slane %v983_v2, 4 }
  0xd7   :  { %v908_v28 = vadd.f32 %v907_v4, %v906_v40  ;;  %v985_v57 = vadd.f32 %v984_v17, %v983_v2 }
  0xd9   :  { %v986_v1 = vrot.slane %v985_v57, 2  ;;  %v941_v48 = vsel %vm939_vm10, %v908_v28, 0.0 }
  0xda   :  { %v943_v24 = vadd.f32 %v941_v48, %v862_v35 }
  0xdb   :  { %v987_v5 = vadd.f32 %v986_v1, %v985_v57 }
  0xdd   :  { %v988_v55 = vrot.slane %v987_v5, 1 }
  0xdf   :  { %v989_v23 = vadd.f32 %v988_v55, %v987_v5 }
  0xe1   :  { %v1022_v37 = vsel %vm1020_vm11, %v989_v23, 0.0 }
  0xe2   :  { %v1024_v8 = vadd.f32 %v1022_v37, %v943_v24 }
  0xe4   :  { %1033 = vadd.xlane.f32.xlu0 %v1024_v8 }
  0xf2   :  { %v1038_v45 = vpop.xlane.xlu1 %1037 }
  0xf3   :  { %v1041_v16 = vadd.f32 %v1038_v45, %v1029_v54 }
  0xf5   :  { %v1092_v36 = vmul.f32 -1.442695, %v1041_v16 }
  0xf7   :  { %1100 = vpow2.f32 %v1092_v36 }
 0x104   :  { %v1101_v50 = vpop.eup %1100 }
 0x105   :  { %v1063_v20 = vadd.f32 1.0, %v1101_v50 }
 0x12e   :  { %v1032_v60 = vpop.xlane.xlu0 %1031 }
 0x12f   :  { %v1035_v9 = vadd.f32 %v1032_v60, %v1029_v54 }
 0x131   :  { %v1090_v11 = vmul.f32 -1.442695, %v1035_v9 }
 0x133   :  { %1102 = vpow2.f32 %v1090_v11 }
 0x134   :  { %1104 = vrcp.f32 %v1063_v20 }
 0x140   :  { %v1103_v22 = vpop.eup %1102 }
 0x141   :  { %v1049_v56 = vadd.f32 1.0, %v1103_v22  ;;  %v1105_v44 = vpop.eup %1104 }
 0x142   :  { %v1069_v46 = vmul.f32 %v1105_v44, %v1041_v16 }
 0x143   :  { %1106 = vrcp.f32 %v1049_v56 }
 0x150   :  { %v1107_v13 = vpop.eup %1106  ;;  %v1040_v14 = vpop.xlane.xlu1 %1039 }
 0x151   :  { %v1055_v25 = vmul.f32 %v1107_v13, %v1035_v9  ;;  %v1042_v52 = vadd.f32 %v1040_v14, %v1030_v38 }
 0x153   :  { %v1071_v34 = vmul.f32 %v1069_v46, %v1055_v25  ;;  %v1093_v58 = vmul.f32 -1.442695, %v1042_v52 }
 0x155   :  { %1075 = vperm.xlu0 %1098, %v1071_v34   ;;  %1108 = vpow2.f32 %v1093_v58 }
 0x162   :  { %v1109_v6 = vpop.eup %1108 }
 0x163   :  { %v1064_v53 = vadd.f32 1.0, %v1109_v6 }
 0x16d   :  { %v1034_v43 = vpop.xlane.xlu0 %1033 }
 0x16e   :  { %v1036_v3 = vadd.f32 %v1034_v43, %v1030_v38 }
 0x170   :  { %v1091_v18 = vmul.f32 -1.442695, %v1036_v3 }
 0x172   :  { %1110 = vpow2.f32 %v1091_v18 }
 0x173   :  { %1112 = vrcp.f32 %v1064_v53 }
 0x17f   :  { %v1111_v63 = vpop.eup %1110 }
 0x180   :  { %v1050_v19 = vadd.f32 1.0, %v1111_v63  ;;  %v1113_v0 = vpop.eup %1112 }
 0x181   :  { %v1070_v31 = vmul.f32 %v1113_v0, %v1042_v52 }
 0x182   :  { %1114 = vrcp.f32 %v1050_v19 }
 0x18f   :  { %v1115_v30 = vpop.eup %1114 }
 0x190   :  { %v1056_v61 = vmul.f32 %v1115_v30, %v1036_v3 }
 0x192   :  { %v1072_v42 = vmul.f32 %v1070_v31, %v1056_v61 }
 0x194   :  { %1080 = vperm.xlu1 %1099, %v1072_v42  }
 0x1d0   :  { %v1076_v7 = vpop.permute.xlu0 %1075 }
 0x1d1   :  { %1083 = vst [vmem:[%s2346_s4] sm:$0xff] %v1076_v7 }
 0x20f   :  { %v1081_v39 = vpop.permute.xlu1 %1080 }
 0x210   :  { %1084 = vst [vmem:[%s2346_s4 + $0x8] sm:$0xff] %v1081_v39 }
 0x211   :  { %1089 = vsyncpa [#allocation3], 1 }

</bundles_post_ra>
